<compile_context>
chip_gen: v7x
topology: tpu7x:2x2x1
jax: 0.10.0
libtpu: 0.0.40
codegen_flags: <defaults>
</compile_context>

<pallas_src>
import math

import jax
import jax.numpy as jnp
import numpy as np
from jax import lax
from jax.experimental import pallas as pl
from jax.experimental.pallas import tpu as pltpu

# ------------------------- model configuration ------------------------------
NUM_HIDDEN_LAYERS = 2     # transformer encoder layers
SIZE_HIDDEN = 32          # size_hidden_layers == d_model == dim_feedforward
NUM_CONV_LAYERS = 1       # encoder keeps (num_conv_layers + 1) Linear+LeakyReLU
NUM_HEADS = 2             # nhead
NUM_OUTPUTS = 6           # Overcooked action space size
OBS_DIM = 4               # per-frame feature dim
IN_DIM = 2 * OBS_DIM      # after [obs, prev_obs] concat
NUM_SEQS = 2
SEQ_LEN = 8
BATCH = NUM_SEQS * SEQ_LEN

BLOCK_ROWS = NUM_SEQS * SEQ_LEN   # rows per grid step (whole batch in the demo)
HEAD_DIM = SIZE_HIDDEN // NUM_HEADS
LANE = 128

LN_EPS = 1e-5
LEAKY_SLOPE = 0.01        # nn.LeakyReLU default negative_slope
MASK_VALUE = -1e30        # finite "minus infinity" for masked attention scores
HEAD_SLAB = 128           # lane-dense fused-head output width (logits | value | zeros)


# --------------------------- static slab layout -------------------------------
def _build_layout():
    """Row offsets of every sub-tensor inside the two packed slabs (static)."""
    w_off, r = {}, 0

    def add_w(name, rows):
        nonlocal r
        w_off[name] = r
        r += rows                              # 8 or 32 -> always 8-aligned

    add_w("enc0", IN_DIM)
    for i in range(NUM_CONV_LAYERS):
        add_w(f"enc{i + 1}", SIZE_HIDDEN)
    for l in range(NUM_HIDDEN_LAYERS):
        add_w(("qkv", l), SIZE_HIDDEN)
        add_w(("wo", l), SIZE_HIDDEN)
        add_w(("ff1", l), SIZE_HIDDEN)
        add_w(("ff2", l), SIZE_HIDDEN)
    add_w("head", SIZE_HIDDEN)
    w_rows = r

    b_off, rb = {}, 0

    def add_b(name):
        nonlocal rb
        b_off[name] = rb
        rb += 1

    add_b("enc0")
    for i in range(NUM_CONV_LAYERS):
        add_b(f"enc{i + 1}")
    for l in range(NUM_HIDDEN_LAYERS):
        for nm in ("bqkv", "bo", "ln1w", "ln1b", "bff1", "bff2", "ln2w", "ln2b"):
            add_b((nm, l))
    add_b("head")
    b_rows = ((rb + 7) // 8) * 8
    return w_off, w_rows, b_off, b_rows


_W_OFF, _W_ROWS, _B_OFF, _B_ROWS = _build_layout()


# ----------------------------- fused Pallas kernel ---------------------------
def _fused_forward_kernel(x_ref, bias_ref, w_ref, b_ref, out_ref):
    """Entire forward pass on VMEM-resident operands; one grid step per row block."""
    H, hd, Bb = SIZE_HIDDEN, HEAD_DIM, BLOCK_ROWS
    scale = 1.0 / math.sqrt(hd)

    def W(name, rows, cols):                       # static, 8-aligned slab slice
        off = _W_OFF[name]
        return w_ref[off:off + rows, 0:cols]

    def Bv(name, cols):                            # single bias/LN row
        off = _B_OFF[name]
        return b_ref[off:off + 1, 0:cols]

    def mm(a, b):
        return jnp.dot(a, b, preferred_element_type=jnp.float32)

    def leaky(y):
        return jnp.where(y >= 0, y, LEAKY_SLOPE * y)

    def layer_norm(y, g, beta):
        mu = jnp.mean(y, axis=-1, keepdims=True)
        var = jnp.mean((y - mu) ** 2, axis=-1, keepdims=True)
        return (y - mu) * lax.rsqrt(var + LN_EPS) * g + beta

    # ---- encoder: (num_conv_layers + 1) x (Linear -> LeakyReLU) ----
    x = leaky(mm(x_ref[...], W("enc0", IN_DIM, H)) + Bv("enc0", H))      # [Bb, H]
    for i in range(NUM_CONV_LAYERS):
        name = f"enc{i + 1}"
        x = leaky(mm(x, W(name, H, H)) + Bv(name, H))

    bias2 = bias_ref[...]                          # [NH*Bb, NH*Bb] head-block mask

    # ---- transformer encoder layers (post-norm, ReLU FFN, eval mode) ----
    for l in range(NUM_HIDDEN_LAYERS):
        # fused in_proj: one matmul for q|k|v
        qkv = mm(x, W(("qkv", l), H, 3 * H)) + Bv(("bqkv", l), 3 * H)    # [Bb, 3H]

        # repack heads onto the sublane axis -> single attention pass for all heads
        q_s = jnp.concatenate(
            [qkv[:, h * hd:(h + 1) * hd] for h in range(NUM_HEADS)], axis=0)
        k_s = jnp.concatenate(
            [qkv[:, H + h * hd:H + (h + 1) * hd] for h in range(NUM_HEADS)], axis=0)
        v_s = jnp.concatenate(
            [qkv[:, 2 * H + h * hd:2 * H + (h + 1) * hd] for h in range(NUM_HEADS)],
            axis=0)                                                       # [NH*Bb, hd]

        s = mm(q_s, k_s.T) * scale + bias2         # block-diag(head) + causal mask
        s = s - jnp.max(s, axis=-1, keepdims=True)
        p = jnp.exp(s)
        p = p * pl.reciprocal(jnp.sum(p, axis=-1, keepdims=True), approx=True)
        o_s = mm(p, v_s)                           # [NH*Bb, hd], head-stacked

        # out-proj: accumulate each head block through its rows of Wo^T
        wo_off = _W_OFF[("wo", l)]
        attn = Bv(("bo", l), H)
        for h in range(NUM_HEADS):
            attn = attn + mm(o_s[h * Bb:(h + 1) * Bb, :],
                             w_ref[wo_off + h * hd: wo_off + (h + 1) * hd, 0:H])

        h1 = layer_norm(x + attn, Bv(("ln1w", l), H), Bv(("ln1b", l), H))
        ff = jnp.maximum(mm(h1, W(("ff1", l), H, H)) + Bv(("bff1", l), H), 0.0)
        ff = mm(ff, W(("ff2", l), H, H)) + Bv(("bff2", l), H)
        x = layer_norm(h1 + ff, Bv(("ln2w", l), H), Bv(("ln2b", l), H))

    # ---- fused action + value heads -> lane-dense [Bb, 128] slab ----
    out_ref[...] = mm(x, W("head", H, HEAD_SLAB)) + Bv("head", HEAD_SLAB)


# --------------------------- one-time model preparation -----------------------
def _make_stacked_attn_bias(block_rows, seq_len, num_heads):
    """[NH*Bb, NH*Bb] additive mask: per-head diagonal blocks carry the
    per-sequence block-causal mask; cross-head blocks are fully masked."""
    idx = np.arange(block_rows)
    same = (idx[:, None] // seq_len) == (idx[None, :] // seq_len)
    causal = idx[None, :] <= idx[:, None]
    base = np.where(same & causal, 0.0, MASK_VALUE).astype(np.float32)
    R = num_heads * block_rows
    full = np.full((R, R), MASK_VALUE, np.float32)
    for h in range(num_heads):
        full[h * block_rows:(h + 1) * block_rows,
             h * block_rows:(h + 1) * block_rows] = base
    return full


def prepare_model(params):
    """Pack every weight/bias ONCE into two contiguous f32 slabs + cached mask."""
    H = SIZE_HIDDEN
    w_slab = np.zeros((_W_ROWS, LANE), np.float32)
    b_slab = np.zeros((_B_ROWS, LANE), np.float32)

    def put_w(name, mat):                      # mat: [in, out] (already transposed)
        m = np.asarray(mat, np.float32)
        off = _W_OFF[name]
        w_slab[off:off + m.shape[0], :m.shape[1]] = m

    def put_b(name, vec):
        v = np.asarray(vec, np.float32).reshape(-1)
        b_slab[_B_OFF[name], :v.shape[0]] = v

    # encoder
    w0, b0 = params["encoder"][0]
    put_w("enc0", np.asarray(w0).T)            # [2C, H]
    put_b("enc0", b0)
    for i, (w, b) in enumerate(params["encoder"][1:]):
        put_w(f"enc{i + 1}", np.asarray(w).T)
        put_b(f"enc{i + 1}", b)

    # transformer layers
    for l, (wqkv, bqkv, wo, bo, ln1w, ln1b,
            w1, b1, w2, b2, ln2w, ln2b) in enumerate(params["transformer"]):
        put_w(("qkv", l), np.asarray(wqkv).T)  # [H, 3H]  (columns = q | k | v)
        put_b(("bqkv", l), bqkv)
        put_w(("wo", l), np.asarray(wo).T)
        put_b(("bo", l), bo)
        put_b(("ln1w", l), ln1w)
        put_b(("ln1b", l), ln1b)
        put_w(("ff1", l), np.asarray(w1).T)
        put_b(("bff1", l), b1)
        put_w(("ff2", l), np.asarray(w2).T)
        put_b(("bff2", l), b2)
        put_b(("ln2w", l), ln2w)
        put_b(("ln2b", l), ln2b)

    # fused action + value head (padded to a lane-dense 128-wide slab)
    aw, ab = params["action_head"]
    vw, vb = params["value_head"]
    wh = np.concatenate([np.asarray(aw), np.asarray(vw)], axis=0)   # [NUM_OUTPUTS+1, H]
    bh = np.concatenate([np.asarray(ab), np.asarray(vb)], axis=0)
    put_w("head", wh.T)
    put_b("head", bh)

    return dict(
        w_slab=jnp.asarray(w_slab),
        b_slab=jnp.asarray(b_slab),
        bias=jnp.asarray(_make_stacked_attn_bias(BLOCK_ROWS, SEQ_LEN, NUM_HEADS)),
    )


# --------------------------- jitted per-call forward ---------------------------
@jax.jit
def _forward_jit(w_slab, b_slab, bias2, obs, prev_obs, state):
    x_in = jnp.concatenate(
        [obs.astype(jnp.float32), prev_obs.astype(jnp.float32)], axis=1)  # [B, 2C]
    B = x_in.shape[0]
    num_blocks = B // BLOCK_ROWS

    out = pl.pallas_call(
        _fused_forward_kernel,
        out_shape=jax.ShapeDtypeStruct((B, HEAD_SLAB), jnp.float32),
        grid=(num_blocks,),
        in_specs=[
            pl.BlockSpec((BLOCK_ROWS, IN_DIM), lambda i: (i, 0)),
            pl.BlockSpec(bias2.shape, lambda i: (0, 0)),
            pl.BlockSpec(w_slab.shape, lambda i: (0, 0)),
            pl.BlockSpec(b_slab.shape, lambda i: (0, 0)),
        ],
        out_specs=pl.BlockSpec((BLOCK_ROWS, HEAD_SLAB), lambda i: (i, 0)),
        compiler_params=pltpu.CompilerParams(
            dimension_semantics=("parallel",),   # shards row blocks across v7x TCs
            vmem_limit_bytes=4 * 1024 * 1024,
        ),
    )(x_in, bias2, w_slab, b_slab)

    logits = out[:, :NUM_OUTPUTS]
    vf = out[:, NUM_OUTPUTS]
    state_out = [s + 1 for s in state]
    return logits, vf, state_out


def overcooked_forward(prepared, obs, prev_obs, seq_lens, state):
    """Mirrors the module forward (vf_share_layers=True, transformer backbone)."""
    # seq_lens only drives the batch -> [N, T] reshape in the reference; the
    # per-sequence causal structure is baked into the cached attention bias.
    # TODO(synk): ragged seq_lens masking is not modeled (all sequences full length).
    del seq_lens
    return _forward_jit(prepared["w_slab"], prepared["b_slab"], prepared["bias"],
                        obs, prev_obs, state)


# --------------------------- parameter creation -------------------------------
def init_params(key):
    keys = iter(jax.random.split(key, 64))

    def lin(out_f, in_f):
        w = jax.random.normal(next(keys), (out_f, in_f), jnp.float32) / math.sqrt(in_f)
        b = 0.05 * jax.random.normal(next(keys), (out_f,), jnp.float32)
        return w, b

    in_channels = 2 * OBS_DIM
    encoder = []
    for i in range(NUM_CONV_LAYERS + 1):
        encoder.append(lin(SIZE_HIDDEN, in_channels if i == 0 else SIZE_HIDDEN))

    transformer = []
    for _ in range(NUM_HIDDEN_LAYERS):
        wqkv, bqkv = lin(3 * SIZE_HIDDEN, SIZE_HIDDEN)   # self_attn.in_proj
        wo, bo = lin(SIZE_HIDDEN, SIZE_HIDDEN)           # self_attn.out_proj
        w1, b1 = lin(SIZE_HIDDEN, SIZE_HIDDEN)           # linear1 (dim_feedforward=H)
        w2, b2 = lin(SIZE_HIDDEN, SIZE_HIDDEN)           # linear2
        ln1w = 1.0 + 0.05 * jax.random.normal(next(keys), (SIZE_HIDDEN,), jnp.float32)
        ln1b = 0.05 * jax.random.normal(next(keys), (SIZE_HIDDEN,), jnp.float32)
        ln2w = 1.0 + 0.05 * jax.random.normal(next(keys), (SIZE_HIDDEN,), jnp.float32)
        ln2b = 0.05 * jax.random.normal(next(keys), (SIZE_HIDDEN,), jnp.float32)
        transformer.append((wqkv, bqkv, wo, bo, ln1w, ln1b, w1, b1, w2, b2, ln2w, ln2b))

    action_head = lin(NUM_OUTPUTS, SIZE_HIDDEN)
    value_head = lin(1, SIZE_HIDDEN)
    return dict(encoder=encoder, transformer=transformer,
                action_head=action_head, value_head=value_head)


# ------------------------- pure-JAX reference (check) -------------------------
def reference_forward(params, obs, prev_obs, seq_lens):
    x = jnp.concatenate([obs, prev_obs], axis=1).astype(jnp.float32)
    for w, b in params["encoder"]:
        y = x @ w.T + b
        x = jnp.where(y >= 0, y, LEAKY_SLOPE * y)
    N = seq_lens.shape[0]
    T = x.shape[0] // N
    H, nh = SIZE_HIDDEN, NUM_HEADS
    hd = H // nh
    seq = x.reshape(N, T, H)
    causal = jnp.tril(jnp.ones((T, T), bool))

    def ln(y, g, b):
        mu = y.mean(-1, keepdims=True)
        var = ((y - mu) ** 2).mean(-1, keepdims=True)
        return (y - mu) / jnp.sqrt(var + LN_EPS) * g + b

    for (wqkv, bqkv, wo, bo, ln1w, ln1b, w1, b1, w2, b2, ln2w, ln2b) in params["transformer"]:
        qkv = seq @ wqkv.T + bqkv
        q, k, v = jnp.split(qkv, 3, axis=-1)
        sh = lambda a: a.reshape(N, T, nh, hd).transpose(0, 2, 1, 3)
        qh, kh, vh = sh(q), sh(k), sh(v)
        s = jnp.einsum("nhqd,nhkd->nhqk", qh, kh) / math.sqrt(hd)
        s = jnp.where(causal, s, -jnp.inf)
        p = jax.nn.softmax(s, axis=-1)
        a = jnp.einsum("nhqk,nhkd->nhqd", p, vh).transpose(0, 2, 1, 3).reshape(N, T, H)
        a = a @ wo.T + bo
        h1 = ln(seq + a, ln1w, ln1b)
        ff = jnp.maximum(h1 @ w1.T + b1, 0.0) @ w2.T + b2
        seq = ln(h1 + ff, ln2w, ln2b)
    out = seq.reshape(-1, H)
    logits = out @ params["action_head"][0].T + params["action_head"][1]
    vf = (out @ params["value_head"][0].T + params["value_head"][1])[:, 0]
    return logits, vf


# ------------------------------------ main ------------------------------------
if __name__ == "__main__":
    key = jax.random.PRNGKey(0)
    pkey, okey, pokey = jax.random.split(key, 3)

    params = init_params(pkey)
    prepared = prepare_model(params)            # one-time packing (cached)

    obs = jax.random.normal(okey, (BATCH, OBS_DIM), jnp.float32)
    prev_obs = jax.random.normal(pokey, (BATCH, OBS_DIM), jnp.float32)
    seq_lens = jnp.full((NUM_SEQS,), SEQ_LEN, jnp.int32)
    state = [jnp.zeros((1,), jnp.float32)]      # fake transformer state

    logits, vf, state_out = overcooked_forward(params and prepared, obs, prev_obs,
                                               seq_lens, state)
    jax.block_until_ready((logits, vf, state_out))

    assert logits.shape == (BATCH, NUM_OUTPUTS)
    assert vf.shape == (BATCH,)
    assert state_out[0].shape == (1,)

    ref_logits, ref_vf = reference_forward(params, obs, prev_obs, seq_lens)
    assert jnp.allclose(logits, ref_logits, atol=2e-2, rtol=2e-2), "logits mismatch"
    assert jnp.allclose(vf, ref_vf, atol=2e-2, rtol=2e-2), "value mismatch"

    # TODO(synk): dropout (p=0.1) in TransformerEncoderLayer is treated as eval-mode
    # identity; RLlib view-requirement / ragged seq_lens bookkeeping stays in plain JAX.
    print("KERNEL_OK")
</pallas_src>

<mosaic_0001>
module attributes {stable_mosaic.version = 11 : i64} {
  func.func @_fused_forward_kernel(%arg0: i32, %arg1: memref<16x8xf32, #tpu.memory_space<vmem>>, %arg2: memref<32x32xf32, #tpu.memory_space<vmem>>, %arg3: memref<328x128xf32, #tpu.memory_space<vmem>>, %arg4: memref<24x128xf32, #tpu.memory_space<vmem>>, %arg5: memref<16x128xf32, #tpu.memory_space<vmem>>) attributes {dimension_semantics = [#tpu.dimension_semantics<parallel>], iteration_bounds = array<i64: 1>, scalar_prefetch = 0 : i64, scratch_operands = 0 : i64, tpu.core_type = #tpu.core_type<tc>, window_params = [{transform_indices = @transform_0, window_bounds = array<i64: 16, 8>}, {pipeline_mode = #tpu.pipeline_mode<synchronous>, transform_indices = @transform_1, window_bounds = array<i64: 32, 32>}, {pipeline_mode = #tpu.pipeline_mode<synchronous>, transform_indices = @transform_2, window_bounds = array<i64: 328, 128>}, {pipeline_mode = #tpu.pipeline_mode<synchronous>, transform_indices = @transform_3, window_bounds = array<i64: 24, 128>}, {transform_indices = @transform_4, window_bounds = array<i64: 16, 128>}]} {
    %c0 = arith.constant 0 : index
    %c0_0 = arith.constant 0 : index
    %0 = vector.load %arg1[%c0, %c0_0] : memref<16x8xf32, #tpu.memory_space<vmem>>, vector<16x8xf32>
    %c0_1 = arith.constant 0 : index
    %c0_2 = arith.constant 0 : index
    %1 = vector.load %arg3[%c0_1, %c0_2] : memref<328x128xf32, #tpu.memory_space<vmem>>, vector<8x32xf32>
    %cst = arith.constant dense<0.000000e+00> : vector<16x32xf32>
    %2 = tpu.matmul %0, %1, %cst {dimension_numbers = #tpu.dot_dimension_numbers<[1], [0], [0], [1], [0, 0, 1, 1], [], []>} : vector<16x8xf32>, vector<8x32xf32>, vector<16x32xf32> -> vector<16x32xf32>
    %c0_3 = arith.constant 0 : index
    %c0_4 = arith.constant 0 : index
    %3 = vector.load %arg4[%c0_3, %c0_4] : memref<24x128xf32, #tpu.memory_space<vmem>>, vector<1x32xf32>
    %4 = vector.broadcast %3 : vector<1x32xf32> to vector<16x32xf32>
    %5 = arith.addf %2, %4 : vector<16x32xf32>
    %cst_5 = arith.constant 0.000000e+00 : f32
    %6 = vector.broadcast %cst_5 : f32 to vector<16x32xf32>
    %7 = arith.cmpf oge, %5, %6 : vector<16x32xf32>
    %cst_6 = arith.constant 0.00999999977 : f32
    %8 = vector.broadcast %cst_6 : f32 to vector<16x32xf32>
    %9 = arith.mulf %8, %5 : vector<16x32xf32>
    %10 = arith.select %7, %5, %9 : vector<16x32xi1>, vector<16x32xf32>
    %c8 = arith.constant 8 : index
    %c0_7 = arith.constant 0 : index
    %11 = vector.load %arg3[%c8, %c0_7] : memref<328x128xf32, #tpu.memory_space<vmem>>, vector<32x32xf32>
    %cst_8 = arith.constant dense<0.000000e+00> : vector<16x32xf32>
    %12 = tpu.matmul %10, %11, %cst_8 {dimension_numbers = #tpu.dot_dimension_numbers<[1], [0], [0], [1], [0, 0, 1, 1], [], []>} : vector<16x32xf32>, vector<32x32xf32>, vector<16x32xf32> -> vector<16x32xf32>
    %c1 = arith.constant 1 : index
    %c0_9 = arith.constant 0 : index
    %13 = vector.load %arg4[%c1, %c0_9] : memref<24x128xf32, #tpu.memory_space<vmem>>, vector<1x32xf32>
    %14 = vector.broadcast %13 : vector<1x32xf32> to vector<16x32xf32>
    %15 = arith.addf %12, %14 : vector<16x32xf32>
    %cst_10 = arith.constant 0.000000e+00 : f32
    %16 = vector.broadcast %cst_10 : f32 to vector<16x32xf32>
    %17 = arith.cmpf oge, %15, %16 : vector<16x32xf32>
    %cst_11 = arith.constant 0.00999999977 : f32
    %18 = vector.broadcast %cst_11 : f32 to vector<16x32xf32>
    %19 = arith.mulf %18, %15 : vector<16x32xf32>
    %20 = arith.select %17, %15, %19 : vector<16x32xi1>, vector<16x32xf32>
    %c0_12 = arith.constant 0 : index
    %c0_13 = arith.constant 0 : index
    %21 = vector.load %arg2[%c0_12, %c0_13] : memref<32x32xf32, #tpu.memory_space<vmem>>, vector<32x32xf32>
    %c40 = arith.constant 40 : index
    %c0_14 = arith.constant 0 : index
    %22 = vector.load %arg3[%c40, %c0_14] : memref<328x128xf32, #tpu.memory_space<vmem>>, vector<32x96xf32>
    %cst_15 = arith.constant dense<0.000000e+00> : vector<16x96xf32>
    %23 = tpu.matmul %20, %22, %cst_15 {dimension_numbers = #tpu.dot_dimension_numbers<[1], [0], [0], [1], [0, 0, 1, 1], [], []>} : vector<16x32xf32>, vector<32x96xf32>, vector<16x96xf32> -> vector<16x96xf32>
    %c2 = arith.constant 2 : index
    %c0_16 = arith.constant 0 : index
    %24 = vector.load %arg4[%c2, %c0_16] : memref<24x128xf32, #tpu.memory_space<vmem>>, vector<1x96xf32>
    %25 = vector.broadcast %24 : vector<1x96xf32> to vector<16x96xf32>
    %26 = arith.addf %23, %25 : vector<16x96xf32>
    %27 = vector.extract_strided_slice %26 {offsets = [0, 0], sizes = [16, 16], strides = [1, 1]} : vector<16x96xf32> to vector<16x16xf32>
    %28 = vector.extract_strided_slice %26 {offsets = [0, 16], sizes = [16, 16], strides = [1, 1]} : vector<16x96xf32> to vector<16x16xf32>
    %29 = tpu.concatenate %27, %28 in 0 : vector<16x16xf32>, vector<16x16xf32> -> vector<32x16xf32>
    %30 = vector.extract_strided_slice %26 {offsets = [0, 32], sizes = [16, 16], strides = [1, 1]} : vector<16x96xf32> to vector<16x16xf32>
    %31 = vector.extract_strided_slice %26 {offsets = [0, 48], sizes = [16, 16], strides = [1, 1]} : vector<16x96xf32> to vector<16x16xf32>
    %32 = tpu.concatenate %30, %31 in 0 : vector<16x16xf32>, vector<16x16xf32> -> vector<32x16xf32>
    %33 = vector.extract_strided_slice %26 {offsets = [0, 64], sizes = [16, 16], strides = [1, 1]} : vector<16x96xf32> to vector<16x16xf32>
    %34 = vector.extract_strided_slice %26 {offsets = [0, 80], sizes = [16, 16], strides = [1, 1]} : vector<16x96xf32> to vector<16x16xf32>
    %35 = tpu.concatenate %33, %34 in 0 : vector<16x16xf32>, vector<16x16xf32> -> vector<32x16xf32>
    %36 = tpu.transpose %32, [1, 0] : vector<32x16xf32> -> vector<16x32xf32>
    %cst_17 = arith.constant dense<0.000000e+00> : vector<32x32xf32>
    %37 = tpu.matmul %29, %36, %cst_17 {dimension_numbers = #tpu.dot_dimension_numbers<[1], [0], [0], [1], [0, 0, 1, 1], [], []>} : vector<32x16xf32>, vector<16x32xf32>, vector<32x32xf32> -> vector<32x32xf32>
    %cst_18 = arith.constant 2.500000e-01 : f32
    %38 = vector.broadcast %cst_18 : f32 to vector<32x32xf32>
    %39 = arith.mulf %37, %38 : vector<32x32xf32>
    %40 = arith.addf %39, %21 : vector<32x32xf32>
    %cst_19 = arith.constant dense<0xFF800000> : vector<32xf32>
    %41 = vector.multi_reduction <maximumf>, %40, %cst_19 [1] : vector<32x32xf32> to vector<32xf32>
    %42 = vector.shape_cast %41 : vector<32xf32> to vector<32x1xf32>
    %43 = vector.broadcast %42 : vector<32x1xf32> to vector<32x32xf32>
    %44 = arith.subf %40, %43 : vector<32x32xf32>
    %45 = math.exp %44 : vector<32x32xf32>
    %cst_20 = arith.constant dense<0.000000e+00> : vector<32xf32>
    %46 = vector.multi_reduction <add>, %45, %cst_20 [1] : vector<32x32xf32> to vector<32xf32>
    %47 = vector.shape_cast %46 : vector<32xf32> to vector<32x1xf32>
    %48 = tpu.reciprocal %47 {approx = true} : vector<32x1xf32> -> vector<32x1xf32>
    %49 = vector.broadcast %48 : vector<32x1xf32> to vector<32x32xf32>
    %50 = arith.mulf %45, %49 : vector<32x32xf32>
    %cst_21 = arith.constant dense<0.000000e+00> : vector<32x16xf32>
    %51 = tpu.matmul %50, %35, %cst_21 {dimension_numbers = #tpu.dot_dimension_numbers<[1], [0], [0], [1], [0, 0, 1, 1], [], []>} : vector<32x32xf32>, vector<32x16xf32>, vector<32x16xf32> -> vector<32x16xf32>
    %c3 = arith.constant 3 : index
    %c0_22 = arith.constant 0 : index
    %52 = vector.load %arg4[%c3, %c0_22] : memref<24x128xf32, #tpu.memory_space<vmem>>, vector<1x32xf32>
    %53 = vector.extract_strided_slice %51 {offsets = [0, 0], sizes = [16, 16], strides = [1, 1]} : vector<32x16xf32> to vector<16x16xf32>
    %c72 = arith.constant 72 : index
    %c0_23 = arith.constant 0 : index
    %54 = vector.load %arg3[%c72, %c0_23] : memref<328x128xf32, #tpu.memory_space<vmem>>, vector<16x32xf32>
    %cst_24 = arith.constant dense<0.000000e+00> : vector<16x32xf32>
    %55 = tpu.matmul %53, %54, %cst_24 {dimension_numbers = #tpu.dot_dimension_numbers<[1], [0], [0], [1], [0, 0, 1, 1], [], []>} : vector<16x16xf32>, vector<16x32xf32>, vector<16x32xf32> -> vector<16x32xf32>
    %56 = vector.broadcast %52 : vector<1x32xf32> to vector<16x32xf32>
    %57 = arith.addf %56, %55 : vector<16x32xf32>
    %58 = vector.extract_strided_slice %51 {offsets = [16, 0], sizes = [16, 16], strides = [1, 1]} : vector<32x16xf32> to vector<16x16xf32>
    %c88 = arith.constant 88 : index
    %c0_25 = arith.constant 0 : index
    %59 = vector.load %arg3[%c88, %c0_25] : memref<328x128xf32, #tpu.memory_space<vmem>>, vector<16x32xf32>
    %cst_26 = arith.constant dense<0.000000e+00> : vector<16x32xf32>
    %60 = tpu.matmul %58, %59, %cst_26 {dimension_numbers = #tpu.dot_dimension_numbers<[1], [0], [0], [1], [0, 0, 1, 1], [], []>} : vector<16x16xf32>, vector<16x32xf32>, vector<16x32xf32> -> vector<16x32xf32>
    %61 = arith.addf %57, %60 : vector<16x32xf32>
    %62 = arith.addf %20, %61 : vector<16x32xf32>
    %c4 = arith.constant 4 : index
    %c0_27 = arith.constant 0 : index
    %63 = vector.load %arg4[%c4, %c0_27] : memref<24x128xf32, #tpu.memory_space<vmem>>, vector<1x32xf32>
    %c5 = arith.constant 5 : index
    %c0_28 = arith.constant 0 : index
    %64 = vector.load %arg4[%c5, %c0_28] : memref<24x128xf32, #tpu.memory_space<vmem>>, vector<1x32xf32>
    %cst_29 = arith.constant dense<0.000000e+00> : vector<16xf32>
    %65 = vector.multi_reduction <add>, %62, %cst_29 [1] : vector<16x32xf32> to vector<16xf32>
    %66 = vector.shape_cast %65 : vector<16xf32> to vector<16x1xf32>
    %cst_30 = arith.constant 3.200000e+01 : f32
    %67 = vector.broadcast %cst_30 : f32 to vector<16x1xf32>
    %68 = arith.divf %66, %67 : vector<16x1xf32>
    %69 = vector.broadcast %68 : vector<16x1xf32> to vector<16x32xf32>
    %70 = arith.subf %62, %69 : vector<16x32xf32>
    %71 = arith.mulf %70, %70 : vector<16x32xf32>
    %cst_31 = arith.constant dense<0.000000e+00> : vector<16xf32>
    %72 = vector.multi_reduction <add>, %71, %cst_31 [1] : vector<16x32xf32> to vector<16xf32>
    %73 = vector.shape_cast %72 : vector<16xf32> to vector<16x1xf32>
    %cst_32 = arith.constant 3.200000e+01 : f32
    %74 = vector.broadcast %cst_32 : f32 to vector<16x1xf32>
    %75 = arith.divf %73, %74 : vector<16x1xf32>
    %76 = vector.broadcast %68 : vector<16x1xf32> to vector<16x32xf32>
    %77 = arith.subf %62, %76 : vector<16x32xf32>
    %cst_33 = arith.constant 9.99999974E-6 : f32
    %78 = vector.broadcast %cst_33 : f32 to vector<16x1xf32>
    %79 = arith.addf %75, %78 : vector<16x1xf32>
    %80 = math.rsqrt %79 : vector<16x1xf32>
    %81 = vector.broadcast %80 : vector<16x1xf32> to vector<16x32xf32>
    %82 = arith.mulf %77, %81 : vector<16x32xf32>
    %83 = vector.broadcast %63 : vector<1x32xf32> to vector<16x32xf32>
    %84 = arith.mulf %82, %83 : vector<16x32xf32>
    %85 = vector.broadcast %64 : vector<1x32xf32> to vector<16x32xf32>
    %86 = arith.addf %84, %85 : vector<16x32xf32>
    %c104 = arith.constant 104 : index
    %c0_34 = arith.constant 0 : index
    %87 = vector.load %arg3[%c104, %c0_34] : memref<328x128xf32, #tpu.memory_space<vmem>>, vector<32x32xf32>
    %cst_35 = arith.constant dense<0.000000e+00> : vector<16x32xf32>
    %88 = tpu.matmul %86, %87, %cst_35 {dimension_numbers = #tpu.dot_dimension_numbers<[1], [0], [0], [1], [0, 0, 1, 1], [], []>} : vector<16x32xf32>, vector<32x32xf32>, vector<16x32xf32> -> vector<16x32xf32>
    %c6 = arith.constant 6 : index
    %c0_36 = arith.constant 0 : index
    %89 = vector.load %arg4[%c6, %c0_36] : memref<24x128xf32, #tpu.memory_space<vmem>>, vector<1x32xf32>
    %90 = vector.broadcast %89 : vector<1x32xf32> to vector<16x32xf32>
    %91 = arith.addf %88, %90 : vector<16x32xf32>
    %cst_37 = arith.constant 0.000000e+00 : f32
    %92 = vector.broadcast %cst_37 : f32 to vector<16x32xf32>
    %93 = arith.maximumf %91, %92 : vector<16x32xf32>
    %c136 = arith.constant 136 : index
    %c0_38 = arith.constant 0 : index
    %94 = vector.load %arg3[%c136, %c0_38] : memref<328x128xf32, #tpu.memory_space<vmem>>, vector<32x32xf32>
    %cst_39 = arith.constant dense<0.000000e+00> : vector<16x32xf32>
    %95 = tpu.matmul %93, %94, %cst_39 {dimension_numbers = #tpu.dot_dimension_numbers<[1], [0], [0], [1], [0, 0, 1, 1], [], []>} : vector<16x32xf32>, vector<32x32xf32>, vector<16x32xf32> -> vector<16x32xf32>
    %c7 = arith.constant 7 : index
    %c0_40 = arith.constant 0 : index
    %96 = vector.load %arg4[%c7, %c0_40] : memref<24x128xf32, #tpu.memory_space<vmem>>, vector<1x32xf32>
    %97 = vector.broadcast %96 : vector<1x32xf32> to vector<16x32xf32>
    %98 = arith.addf %95, %97 : vector<16x32xf32>
    %99 = arith.addf %86, %98 : vector<16x32xf32>
    %c8_41 = arith.constant 8 : index
    %c0_42 = arith.constant 0 : index
    %100 = vector.load %arg4[%c8_41, %c0_42] : memref<24x128xf32, #tpu.memory_space<vmem>>, vector<1x32xf32>
    %c9 = arith.constant 9 : index
    %c0_43 = arith.constant 0 : index
    %101 = vector.load %arg4[%c9, %c0_43] : memref<24x128xf32, #tpu.memory_space<vmem>>, vector<1x32xf32>
    %cst_44 = arith.constant dense<0.000000e+00> : vector<16xf32>
    %102 = vector.multi_reduction <add>, %99, %cst_44 [1] : vector<16x32xf32> to vector<16xf32>
    %103 = vector.shape_cast %102 : vector<16xf32> to vector<16x1xf32>
    %cst_45 = arith.constant 3.200000e+01 : f32
    %104 = vector.broadcast %cst_45 : f32 to vector<16x1xf32>
    %105 = arith.divf %103, %104 : vector<16x1xf32>
    %106 = vector.broadcast %105 : vector<16x1xf32> to vector<16x32xf32>
    %107 = arith.subf %99, %106 : vector<16x32xf32>
    %108 = arith.mulf %107, %107 : vector<16x32xf32>
    %cst_46 = arith.constant dense<0.000000e+00> : vector<16xf32>
    %109 = vector.multi_reduction <add>, %108, %cst_46 [1] : vector<16x32xf32> to vector<16xf32>
    %110 = vector.shape_cast %109 : vector<16xf32> to vector<16x1xf32>
    %cst_47 = arith.constant 3.200000e+01 : f32
    %111 = vector.broadcast %cst_47 : f32 to vector<16x1xf32>
    %112 = arith.divf %110, %111 : vector<16x1xf32>
    %113 = vector.broadcast %105 : vector<16x1xf32> to vector<16x32xf32>
    %114 = arith.subf %99, %113 : vector<16x32xf32>
    %cst_48 = arith.constant 9.99999974E-6 : f32
    %115 = vector.broadcast %cst_48 : f32 to vector<16x1xf32>
    %116 = arith.addf %112, %115 : vector<16x1xf32>
    %117 = math.rsqrt %116 : vector<16x1xf32>
    %118 = vector.broadcast %117 : vector<16x1xf32> to vector<16x32xf32>
    %119 = arith.mulf %114, %118 : vector<16x32xf32>
    %120 = vector.broadcast %100 : vector<1x32xf32> to vector<16x32xf32>
    %121 = arith.mulf %119, %120 : vector<16x32xf32>
    %122 = vector.broadcast %101 : vector<1x32xf32> to vector<16x32xf32>
    %123 = arith.addf %121, %122 : vector<16x32xf32>
    %c168 = arith.constant 168 : index
    %c0_49 = arith.constant 0 : index
    %124 = vector.load %arg3[%c168, %c0_49] : memref<328x128xf32, #tpu.memory_space<vmem>>, vector<32x96xf32>
    %cst_50 = arith.constant dense<0.000000e+00> : vector<16x96xf32>
    %125 = tpu.matmul %123, %124, %cst_50 {dimension_numbers = #tpu.dot_dimension_numbers<[1], [0], [0], [1], [0, 0, 1, 1], [], []>} : vector<16x32xf32>, vector<32x96xf32>, vector<16x96xf32> -> vector<16x96xf32>
    %c10 = arith.constant 10 : index
    %c0_51 = arith.constant 0 : index
    %126 = vector.load %arg4[%c10, %c0_51] : memref<24x128xf32, #tpu.memory_space<vmem>>, vector<1x96xf32>
    %127 = vector.broadcast %126 : vector<1x96xf32> to vector<16x96xf32>
    %128 = arith.addf %125, %127 : vector<16x96xf32>
    %129 = vector.extract_strided_slice %128 {offsets = [0, 0], sizes = [16, 16], strides = [1, 1]} : vector<16x96xf32> to vector<16x16xf32>
    %130 = vector.extract_strided_slice %128 {offsets = [0, 16], sizes = [16, 16], strides = [1, 1]} : vector<16x96xf32> to vector<16x16xf32>
    %131 = tpu.concatenate %129, %130 in 0 : vector<16x16xf32>, vector<16x16xf32> -> vector<32x16xf32>
    %132 = vector.extract_strided_slice %128 {offsets = [0, 32], sizes = [16, 16], strides = [1, 1]} : vector<16x96xf32> to vector<16x16xf32>
    %133 = vector.extract_strided_slice %128 {offsets = [0, 48], sizes = [16, 16], strides = [1, 1]} : vector<16x96xf32> to vector<16x16xf32>
    %134 = tpu.concatenate %132, %133 in 0 : vector<16x16xf32>, vector<16x16xf32> -> vector<32x16xf32>
    %135 = vector.extract_strided_slice %128 {offsets = [0, 64], sizes = [16, 16], strides = [1, 1]} : vector<16x96xf32> to vector<16x16xf32>
    %136 = vector.extract_strided_slice %128 {offsets = [0, 80], sizes = [16, 16], strides = [1, 1]} : vector<16x96xf32> to vector<16x16xf32>
    %137 = tpu.concatenate %135, %136 in 0 : vector<16x16xf32>, vector<16x16xf32> -> vector<32x16xf32>
    %138 = tpu.transpose %134, [1, 0] : vector<32x16xf32> -> vector<16x32xf32>
    %cst_52 = arith.constant dense<0.000000e+00> : vector<32x32xf32>
    %139 = tpu.matmul %131, %138, %cst_52 {dimension_numbers = #tpu.dot_dimension_numbers<[1], [0], [0], [1], [0, 0, 1, 1], [], []>} : vector<32x16xf32>, vector<16x32xf32>, vector<32x32xf32> -> vector<32x32xf32>
    %cst_53 = arith.constant 2.500000e-01 : f32
    %140 = vector.broadcast %cst_53 : f32 to vector<32x32xf32>
    %141 = arith.mulf %139, %140 : vector<32x32xf32>
    %142 = arith.addf %141, %21 : vector<32x32xf32>
    %cst_54 = arith.constant dense<0xFF800000> : vector<32xf32>
    %143 = vector.multi_reduction <maximumf>, %142, %cst_54 [1] : vector<32x32xf32> to vector<32xf32>
    %144 = vector.shape_cast %143 : vector<32xf32> to vector<32x1xf32>
    %145 = vector.broadcast %144 : vector<32x1xf32> to vector<32x32xf32>
    %146 = arith.subf %142, %145 : vector<32x32xf32>
    %147 = math.exp %146 : vector<32x32xf32>
    %cst_55 = arith.constant dense<0.000000e+00> : vector<32xf32>
    %148 = vector.multi_reduction <add>, %147, %cst_55 [1] : vector<32x32xf32> to vector<32xf32>
    %149 = vector.shape_cast %148 : vector<32xf32> to vector<32x1xf32>
    %150 = tpu.reciprocal %149 {approx = true} : vector<32x1xf32> -> vector<32x1xf32>
    %151 = vector.broadcast %150 : vector<32x1xf32> to vector<32x32xf32>
    %152 = arith.mulf %147, %151 : vector<32x32xf32>
    %cst_56 = arith.constant dense<0.000000e+00> : vector<32x16xf32>
    %153 = tpu.matmul %152, %137, %cst_56 {dimension_numbers = #tpu.dot_dimension_numbers<[1], [0], [0], [1], [0, 0, 1, 1], [], []>} : vector<32x32xf32>, vector<32x16xf32>, vector<32x16xf32> -> vector<32x16xf32>
    %c11 = arith.constant 11 : index
    %c0_57 = arith.constant 0 : index
    %154 = vector.load %arg4[%c11, %c0_57] : memref<24x128xf32, #tpu.memory_space<vmem>>, vector<1x32xf32>
    %155 = vector.extract_strided_slice %153 {offsets = [0, 0], sizes = [16, 16], strides = [1, 1]} : vector<32x16xf32> to vector<16x16xf32>
    %c200 = arith.constant 200 : index
    %c0_58 = arith.constant 0 : index
    %156 = vector.load %arg3[%c200, %c0_58] : memref<328x128xf32, #tpu.memory_space<vmem>>, vector<16x32xf32>
    %cst_59 = arith.constant dense<0.000000e+00> : vector<16x32xf32>
    %157 = tpu.matmul %155, %156, %cst_59 {dimension_numbers = #tpu.dot_dimension_numbers<[1], [0], [0], [1], [0, 0, 1, 1], [], []>} : vector<16x16xf32>, vector<16x32xf32>, vector<16x32xf32> -> vector<16x32xf32>
    %158 = vector.broadcast %154 : vector<1x32xf32> to vector<16x32xf32>
    %159 = arith.addf %158, %157 : vector<16x32xf32>
    %160 = vector.extract_strided_slice %153 {offsets = [16, 0], sizes = [16, 16], strides = [1, 1]} : vector<32x16xf32> to vector<16x16xf32>
    %c216 = arith.constant 216 : index
    %c0_60 = arith.constant 0 : index
    %161 = vector.load %arg3[%c216, %c0_60] : memref<328x128xf32, #tpu.memory_space<vmem>>, vector<16x32xf32>
    %cst_61 = arith.constant dense<0.000000e+00> : vector<16x32xf32>
    %162 = tpu.matmul %160, %161, %cst_61 {dimension_numbers = #tpu.dot_dimension_numbers<[1], [0], [0], [1], [0, 0, 1, 1], [], []>} : vector<16x16xf32>, vector<16x32xf32>, vector<16x32xf32> -> vector<16x32xf32>
    %163 = arith.addf %159, %162 : vector<16x32xf32>
    %164 = arith.addf %123, %163 : vector<16x32xf32>
    %c12 = arith.constant 12 : index
    %c0_62 = arith.constant 0 : index
    %165 = vector.load %arg4[%c12, %c0_62] : memref<24x128xf32, #tpu.memory_space<vmem>>, vector<1x32xf32>
    %c13 = arith.constant 13 : index
    %c0_63 = arith.constant 0 : index
    %166 = vector.load %arg4[%c13, %c0_63] : memref<24x128xf32, #tpu.memory_space<vmem>>, vector<1x32xf32>
    %cst_64 = arith.constant dense<0.000000e+00> : vector<16xf32>
    %167 = vector.multi_reduction <add>, %164, %cst_64 [1] : vector<16x32xf32> to vector<16xf32>
    %168 = vector.shape_cast %167 : vector<16xf32> to vector<16x1xf32>
    %cst_65 = arith.constant 3.200000e+01 : f32
    %169 = vector.broadcast %cst_65 : f32 to vector<16x1xf32>
    %170 = arith.divf %168, %169 : vector<16x1xf32>
    %171 = vector.broadcast %170 : vector<16x1xf32> to vector<16x32xf32>
    %172 = arith.subf %164, %171 : vector<16x32xf32>
    %173 = arith.mulf %172, %172 : vector<16x32xf32>
    %cst_66 = arith.constant dense<0.000000e+00> : vector<16xf32>
    %174 = vector.multi_reduction <add>, %173, %cst_66 [1] : vector<16x32xf32> to vector<16xf32>
    %175 = vector.shape_cast %174 : vector<16xf32> to vector<16x1xf32>
    %cst_67 = arith.constant 3.200000e+01 : f32
    %176 = vector.broadcast %cst_67 : f32 to vector<16x1xf32>
    %177 = arith.divf %175, %176 : vector<16x1xf32>
    %178 = vector.broadcast %170 : vector<16x1xf32> to vector<16x32xf32>
    %179 = arith.subf %164, %178 : vector<16x32xf32>
    %cst_68 = arith.constant 9.99999974E-6 : f32
    %180 = vector.broadcast %cst_68 : f32 to vector<16x1xf32>
    %181 = arith.addf %177, %180 : vector<16x1xf32>
    %182 = math.rsqrt %181 : vector<16x1xf32>
    %183 = vector.broadcast %182 : vector<16x1xf32> to vector<16x32xf32>
    %184 = arith.mulf %179, %183 : vector<16x32xf32>
    %185 = vector.broadcast %165 : vector<1x32xf32> to vector<16x32xf32>
    %186 = arith.mulf %184, %185 : vector<16x32xf32>
    %187 = vector.broadcast %166 : vector<1x32xf32> to vector<16x32xf32>
    %188 = arith.addf %186, %187 : vector<16x32xf32>
    %c232 = arith.constant 232 : index
    %c0_69 = arith.constant 0 : index
    %189 = vector.load %arg3[%c232, %c0_69] : memref<328x128xf32, #tpu.memory_space<vmem>>, vector<32x32xf32>
    %cst_70 = arith.constant dense<0.000000e+00> : vector<16x32xf32>
    %190 = tpu.matmul %188, %189, %cst_70 {dimension_numbers = #tpu.dot_dimension_numbers<[1], [0], [0], [1], [0, 0, 1, 1], [], []>} : vector<16x32xf32>, vector<32x32xf32>, vector<16x32xf32> -> vector<16x32xf32>
    %c14 = arith.constant 14 : index
    %c0_71 = arith.constant 0 : index
    %191 = vector.load %arg4[%c14, %c0_71] : memref<24x128xf32, #tpu.memory_space<vmem>>, vector<1x32xf32>
    %192 = vector.broadcast %191 : vector<1x32xf32> to vector<16x32xf32>
    %193 = arith.addf %190, %192 : vector<16x32xf32>
    %cst_72 = arith.constant 0.000000e+00 : f32
    %194 = vector.broadcast %cst_72 : f32 to vector<16x32xf32>
    %195 = arith.maximumf %193, %194 : vector<16x32xf32>
    %c264 = arith.constant 264 : index
    %c0_73 = arith.constant 0 : index
    %196 = vector.load %arg3[%c264, %c0_73] : memref<328x128xf32, #tpu.memory_space<vmem>>, vector<32x32xf32>
    %cst_74 = arith.constant dense<0.000000e+00> : vector<16x32xf32>
    %197 = tpu.matmul %195, %196, %cst_74 {dimension_numbers = #tpu.dot_dimension_numbers<[1], [0], [0], [1], [0, 0, 1, 1], [], []>} : vector<16x32xf32>, vector<32x32xf32>, vector<16x32xf32> -> vector<16x32xf32>
    %c15 = arith.constant 15 : index
    %c0_75 = arith.constant 0 : index
    %198 = vector.load %arg4[%c15, %c0_75] : memref<24x128xf32, #tpu.memory_space<vmem>>, vector<1x32xf32>
    %199 = vector.broadcast %198 : vector<1x32xf32> to vector<16x32xf32>
    %200 = arith.addf %197, %199 : vector<16x32xf32>
    %201 = arith.addf %188, %200 : vector<16x32xf32>
    %c16 = arith.constant 16 : index
    %c0_76 = arith.constant 0 : index
    %202 = vector.load %arg4[%c16, %c0_76] : memref<24x128xf32, #tpu.memory_space<vmem>>, vector<1x32xf32>
    %c17 = arith.constant 17 : index
    %c0_77 = arith.constant 0 : index
    %203 = vector.load %arg4[%c17, %c0_77] : memref<24x128xf32, #tpu.memory_space<vmem>>, vector<1x32xf32>
    %cst_78 = arith.constant dense<0.000000e+00> : vector<16xf32>
    %204 = vector.multi_reduction <add>, %201, %cst_78 [1] : vector<16x32xf32> to vector<16xf32>
    %205 = vector.shape_cast %204 : vector<16xf32> to vector<16x1xf32>
    %cst_79 = arith.constant 3.200000e+01 : f32
    %206 = vector.broadcast %cst_79 : f32 to vector<16x1xf32>
    %207 = arith.divf %205, %206 : vector<16x1xf32>
    %208 = vector.broadcast %207 : vector<16x1xf32> to vector<16x32xf32>
    %209 = arith.subf %201, %208 : vector<16x32xf32>
    %210 = arith.mulf %209, %209 : vector<16x32xf32>
    %cst_80 = arith.constant dense<0.000000e+00> : vector<16xf32>
    %211 = vector.multi_reduction <add>, %210, %cst_80 [1] : vector<16x32xf32> to vector<16xf32>
    %212 = vector.shape_cast %211 : vector<16xf32> to vector<16x1xf32>
    %cst_81 = arith.constant 3.200000e+01 : f32
    %213 = vector.broadcast %cst_81 : f32 to vector<16x1xf32>
    %214 = arith.divf %212, %213 : vector<16x1xf32>
    %215 = vector.broadcast %207 : vector<16x1xf32> to vector<16x32xf32>
    %216 = arith.subf %201, %215 : vector<16x32xf32>
    %cst_82 = arith.constant 9.99999974E-6 : f32
    %217 = vector.broadcast %cst_82 : f32 to vector<16x1xf32>
    %218 = arith.addf %214, %217 : vector<16x1xf32>
    %219 = math.rsqrt %218 : vector<16x1xf32>
    %220 = vector.broadcast %219 : vector<16x1xf32> to vector<16x32xf32>
    %221 = arith.mulf %216, %220 : vector<16x32xf32>
    %222 = vector.broadcast %202 : vector<1x32xf32> to vector<16x32xf32>
    %223 = arith.mulf %221, %222 : vector<16x32xf32>
    %224 = vector.broadcast %203 : vector<1x32xf32> to vector<16x32xf32>
    %225 = arith.addf %223, %224 : vector<16x32xf32>
    %c296 = arith.constant 296 : index
    %c0_83 = arith.constant 0 : index
    %226 = vector.load %arg3[%c296, %c0_83] : memref<328x128xf32, #tpu.memory_space<vmem>>, vector<32x128xf32>
    %cst_84 = arith.constant dense<0.000000e+00> : vector<16x128xf32>
    %227 = tpu.matmul %225, %226, %cst_84 {dimension_numbers = #tpu.dot_dimension_numbers<[1], [0], [0], [1], [0, 0, 1, 1], [], []>} : vector<16x32xf32>, vector<32x128xf32>, vector<16x128xf32> -> vector<16x128xf32>
    %c18 = arith.constant 18 : index
    %c0_85 = arith.constant 0 : index
    %228 = vector.load %arg4[%c18, %c0_85] : memref<24x128xf32, #tpu.memory_space<vmem>>, vector<1x128xf32>
    %229 = vector.broadcast %228 : vector<1x128xf32> to vector<16x128xf32>
    %230 = arith.addf %227, %229 : vector<16x128xf32>
    %c0_86 = arith.constant 0 : index
    %c0_87 = arith.constant 0 : index
    %231 = vector.load %arg5[%c0_86, %c0_87] : memref<16x128xf32, #tpu.memory_space<vmem>>, vector<16x128xf32>
    tpu.vector_store %arg5[%c0_86, %c0_87], %230 {strides = array<i32>} : memref<16x128xf32, #tpu.memory_space<vmem>>, vector<16x128xf32>,
    return
  }
  func.func @transform_0(%arg0: i32) -> (i32, i32) {
    %c0_i32 = arith.constant 0 : i32
    %c0_i32_0 = arith.constant 0 : i32
    return %arg0, %c0_i32 : i32, i32
  }
  func.func @transform_1(%arg0: i32) -> (i32, i32) {
    %c0_i32 = arith.constant 0 : i32
    %c0_i32_0 = arith.constant 0 : i32
    %c0_i32_1 = arith.constant 0 : i32
    return %c0_i32, %c0_i32_0 : i32, i32
  }
  func.func @transform_2(%arg0: i32) -> (i32, i32) {
    %c0_i32 = arith.constant 0 : i32
    %c0_i32_0 = arith.constant 0 : i32
    %c0_i32_1 = arith.constant 0 : i32
    return %c0_i32, %c0_i32_0 : i32, i32
  }
  func.func @transform_3(%arg0: i32) -> (i32, i32) {
    %c0_i32 = arith.constant 0 : i32
    %c0_i32_0 = arith.constant 0 : i32
    %c0_i32_1 = arith.constant 0 : i32
    return %c0_i32, %c0_i32_0 : i32, i32
  }
  func.func @transform_4(%arg0: i32) -> (i32, i32) {
    %c0_i32 = arith.constant 0 : i32
    %c0_i32_0 = arith.constant 0 : i32
    return %arg0, %c0_i32 : i32, i32
  }
}

</mosaic_0001>

<bundles_post_ra>
// kernel: _forward_jit.1
= control target key start
LH: loop header
LB: loop body
LE: loop exit
PB: predicated region body
PF: predicated region fallthrough
CT: control target
= control target key end

     0   :  { %9 = vsyncpa [#allocation3], 0  ;;  %s2532_s15 = smov [#allocation2]   ;;  %s2810_s0 = inlined_call_operand.vmem [shape: f32[16,8], index: 0, kind: input, shape index: {}]   ;;  %s2811_s1 = inlined_call_operand.vmem [shape: f32[32,32], index: 1, kind: input, shape index: {}]   ;;  %s2812_s2 = inlined_call_operand.hbm [shape: f32[328,128], index: 2, kind: input, shape index: {}]   ;;  %s2813_s3 = inlined_call_operand.vmem [shape: f32[24,128], index: 3, kind: input, shape index: {}]   ;;  %s2814_s4 = inlined_call_operand.vmem [shape: f32[16,128], index: 4, kind: output, shape index: {}]  }
   0x1   :  { %s19_s16 = sshll.u32 %s2532_s15, 4  ;;  %s2508_s19 = scalar_lea.hbm %s2812_s2, 5248  ;;  %s20_s16 = int_to_ptr.vmem [resolvable:$true] %s19_s16 }
   0x2   :  { %p2509_p0 = scmp.ne.s32.totalorder %s2812_s2, %s2508_s19  ;;  %p2512_p1 = scmp.lt.u32.totalorder %s2508_s19, %s2812_s2 }
   0x4   :  { %p2514_p2 = pnand %p2512_p1, %p2509_p0 }
   0x6   :  { %2517 = shalt.err (!%p2514_p2)
}
   0x7   :  { %s2518_s24 = scalar_lea.vmem %s20_s16, 5248  ;;  %p2523_p4 = scmp.lt.s32.totalorder %s20_s16, %s20_s16 }
   0x8   :  { %p2519_p3 = scmp.ne.s32.totalorder %s20_s16, %s2518_s24  ;;  %p2524_p5 = scmp.lt.s32.totalorder %s2518_s24, %s2518_s24 }
   0xa   :  { %p2525_p6 = por %p2524_p5, %p2523_p4 }
   0xc   :  { %p2526_p7 = pnand %p2525_p6, %p2519_p3 }
   0xe   :  { %2529 = shalt.err (!%p2526_p7)
}
   0xf   :  { %s2533_s25 = smov 128   ;;  %s2534_s26 = smov 8  }
  0x10   :  { %25 = dma.hbm_to_vmem [thread:$0]  %s2812_s2, 5248, %s20_s16, [#allocation3], %s2533_s25, %s2533_s25, %s2534_s26  }
  0x11   :  { %2530 = dma.done.wait [#allocation3], 5248  }
  0x12   :  { %2531 = vsyncadd [#allocation3], 4294962048  ;;  %vm39_vm0 = vcmask 64512   ;;  %v33_v0 = vld [vmem:[#allocation2] sm:$0xff]  ;;  %v32_v2 = vld [vmem:[%s2810_s0 + $0x8] sm:$0xff]  ;;  %vm136_vm3 = vcmask 261120  }
  0x13   :  { %v31_v1 = vld [vmem:[%s2810_s0] sm:$0xff]  ;;  %2109 = vmatprep.subr.mxu0 %v33_v0  ;;  %v127_v3 = vld [vmem:[#allocation2 + $0x8] sm:$0xff]  ;;  %v128_v4 = vld [vmem:[#allocation2 + $0x10] sm:$0xff]  ;;  %vm332_vm6 = vcmask 130048   ;;  %s2535_s11 = smov 112   ;;  %s2536_s12 = smov 96  }
  0x14   :  { %2111 = vmatprep.mubr.msk.f32.mxu0 %vm39_vm0, %v31_v1  ;;  %2110 = vmatpush3.msra.mxu0 %v33_v0  ;;  %v2286_v5 = vpack.c.bf16 %v128_v4, %v127_v3  ;;  %v129_v6 = vld [vmem:[#allocation2 + $0x18] sm:$0xff]  ;;  %v130_v7 = vld [vmem:[#allocation2 + $0x20] sm:$0xff]  ;;  %v228_v18 = vld [vmem:[#allocation2 + $0x28] sm:$0xff] }
  0x15   :  { %2112 = vmatmul.mubr.msk.f32.vlgmr.msra.gmra.mrb[0].mxu0 %vm39_vm0, %v32_v2  ;;  %v2290_v8 = vpack.c.bf16 %v130_v7, %v129_v6  ;;  %v1941_v9 = vld [vmem:[%s2813_s3] ss:$0 sm:$0xff]  ;;  %v229_v19 = vld [vmem:[#allocation2 + $0x30] sm:$0xff]  ;;  %v230_v21 = vld [vmem:[#allocation2 + $0x38] sm:$0xff] }
  0x16   :  { %2287 = vmatprep.subr.bf16.mxu1 %v2286_v5  ;;  %v2294_v20 = vpack.c.bf16 %v229_v19, %v228_v18  ;;  %v231_v22 = vld [vmem:[#allocation2 + $0x40] sm:$0xff]  ;;  %vm2609_vm7 = vmpackc.low %vm332_vm6, %vm332_vm6  ;;  %v2631_v52 = vld [vmem:[%s2811_s1 + $0x8] sm:$0xff] }
  0x17   :  { %2289 = vmatpush3.bf16.msra.mxu1 %v2286_v5  ;;  %v2298_v23 = vpack.c.bf16 %v231_v22, %v230_v21  ;;  %v1944_v24 = vld [vmem:[%s2813_s3 + $0x1] ss:$0 sm:$0xff]  ;;  %v1947_v33 = vld [vmem:[%s2813_s3 + $0x2] ss:$0 sm:$0xff]  ;;  %v2644_v62 = vld [vmem:[%s2811_s1 + $0x10] sm:$0xff] }
  0x18   :  { %2291 = vmatprep.subr.bf16.mxu1 %v2290_v8  ;;  %2295 = vmatprep.subr.bf16.mxu0 %v2294_v20  ;;  %v2636_v55 = vld [vmem:[%s2811_s1] sm:$0xff]  ;;  %v2650_v2 = vld [vmem:[%s2811_s1 + $0x18] sm:$0xff]  ;;  %s2537_s1 = smov 64  }
  0x19   :  { %2297 = vmatpush3.bf16.msra.mxu0 %v2294_v20 }
  0x1a   :  { %2299 = vmatprep.subr.bf16.mxu0 %v2298_v23 }
  0x1b   :  { %2293 = vmatpush3.bf16.msra.mxu1 %v2290_v8 }
  0x1d   :  { %2301 = vmatpush3.bf16.msra.mxu0 %v2298_v23 }
  0xe8   :  { %v2113_v10 = vpop.f32.mrb[0].mxu0 }
  0xe9   :  { %v118_v11 = vadd.f32 %v2113_v10, %v1941_v9  ;;  %v112_v12 = vpop.f32.mrb[1].mxu0 }
  0xea   :  { %v113_v13 = vadd.f32 %v1941_v9, %v112_v12 }
  0xeb   :  { %v124_v14 = vmul.f32 0.01, %v118_v11  ;;  %vm122_vm1 = vcmp.ge.f32.partialorder %v118_v11, 0.0 }
  0xec   :  { %vm121_vm2 = vcmp.ge.f32.partialorder %v113_v13, 0.0  ;;  %v123_v15 = vmul.f32 0.01, %v113_v13 }
  0xed   :  { %v126_v17 = vsel %vm122_vm1, %v118_v11, %v124_v14 }
  0xee   :  { %v125_v16 = vsel %vm121_vm2, %v113_v13, %v123_v15 }
  0xef   :  { %2122 = vmatprep.mubr.msk.f32.mxu1 %vm136_vm3, %v125_v16 }
  0xf0   :  { %2123 = vmatmul.mubr.msk.f32.vlgmr.msra.gmra.mrb[0].mxu1 %vm136_vm3, %v126_v17 }
 0x1c3   :  { %v2124_v25 = vpop.f32.mrb[0].mxu1 }
 0x1c4   :  { %v215_v26 = vadd.f32 %v2124_v25, %v1944_v24  ;;  %v209_v27 = vpop.f32.mrb[1].mxu1 }
 0x1c5   :  { %v210_v28 = vadd.f32 %v1944_v24, %v209_v27 }
 0x1c6   :  { %v221_v29 = vmul.f32 0.01, %v215_v26  ;;  %vm219_vm4 = vcmp.ge.f32.partialorder %v215_v26, 0.0 }
 0x1c7   :  { %vm218_vm5 = vcmp.ge.f32.partialorder %v210_v28, 0.0  ;;  %v220_v30 = vmul.f32 0.01, %v210_v28 }
 0x1c8   :  { %v2591_v32 = vsel %vm219_vm4, %v215_v26, %v221_v29 }
 0x1c9   :  { %v2589_v31 = vsel %vm218_vm5, %v210_v28, %v220_v30 }
 0x1ca   :  { %2133 = vmatprep.mubr.msk.f32.mxu0 %vm136_vm3, %v2589_v31 }
 0x1cb   :  { %2134 = vmatmul.mubr.msk.f32.vlgmr.msra.gmra.mrb[2].mxu0 %vm136_vm3, %v2591_v32 }
 0x29e   :  { %v2135_v34 = vpop.f32.mrb[2].mxu0 }
 0x29f   :  { %v315_v35 = vadd.f32 %v2135_v34, %v1947_v33  ;;  %v309_v36 = vpop.f32.mrb[3].mxu0 }
 0x2a0   :  { %v310_v37 = vadd.f32 %v1947_v33, %v309_v36 }
 0x2a2   :  { %320 = vrot.lane.b32.xlu0 %v310_v37, %s2535_s11  ;;  %2144 = vmatprep.mubr.msk.f32.mxu1 %vm332_vm6, %v310_v37  ;;  %v2602_v38 = vpack.i.bf16 %v315_v35, %v310_v37 }
 0x2a4   :  { %2421 = vrot.lane.b32.xlu1 %v2602_v38, %s2536_s12 }
 0x2a6   :  { %322 = vrot.lane.b32.xlu0 %v315_v35, %s2535_s11 }
 0x314   :  { %v321_v39 = vpop.permute.xlu0 %320 }
 0x316   :  { %v2422_v40 = vpop.permute.xlu1 %2421 }
 0x317   :  { %v2424_v41 = vunpack.i.h.bf16 %v2422_v40  ;;  %v2423_v42 = vunpack.i.l.bf16 %v2422_v40 }
 0x318   :  { %v323_v43 = vpop.permute.xlu0 %322 }
 0x319   :  { %v2302_v45 = vpack.c.bf16 %v2424_v41, %v2423_v42  ;;  %v2613_v46 = vpack.i.bf16 %v323_v43, %v321_v39  ;;  %v596_v41 = vld [vmem:[#allocation2 + $0x48] sm:$0xff] }
 0x31b   :  { %2304 = vmatprep.subr.msk.bf16.mxu1 %vm2609_vm7, %v2302_v45  ;;  %2426 = vrot.lane.b32.xlu1 %v2613_v46, %s2536_s12 }
 0x31c   :  { %2307 = vmatpush3.bf16.xpose.msk.msra.mxu1 %vm2609_vm7, %v2302_v45 }
 0x38d   :  { %v2427_v47 = vpop.permute.xlu1 %2426 }
 0x38e   :  { %v2429_v48 = vunpack.i.h.bf16 %v2427_v47  ;;  %v2428_v49 = vunpack.i.l.bf16 %v2427_v47 }
 0x390   :  { %v2308_v50 = vpack.c.bf16 %v2429_v48, %v2428_v49 }
 0x392   :  { %2310 = vmatprep.subr.msk.bf16.mxu1 %vm2609_vm7, %v2308_v50 }
 0x393   :  { %2313 = vmatpush3.bf16.xpose.msk.msra.mxu1 %vm2609_vm7, %v2308_v50 }
 0x39a   :  { %2145 = vmatmul.mubr.msk.f32.vlgmr.msra.gmra.mrb[2].mxu1 %vm332_vm6, %v315_v35 }
 0x39b   :  { %2147 = vmatprep.mubr.msk.f32.mxu1 %vm332_vm6, %v321_v39 }
 0x39e   :  { %2148 = vmatmul.mubr.msk.f32.gmra.mrb[4].mxu1 %vm332_vm6, %v323_v43 }
 0x46d   :  { %v2146_v51 = vpop.f32.mrb[2].mxu1 }
 0x46e   :  { %v435_v53 = vmul.f32 0.25, %v2146_v51  ;;  %v415_v54 = vpop.f32.mrb[3].mxu1 }
 0x46f   :  { %v434_v56 = vmul.f32 0.25, %v415_v54  ;;  %v685_v54 = vld [vmem:[#allocation2 + $0x58] sm:$0xff] }
 0x470   :  { %v439_v57 = vadd.f32 %v435_v53, %v2631_v52 }
 0x471   :  { %v2149_v58 = vpop.f32.mrb[4].mxu1  ;;  %v438_v59 = vadd.f32 %v434_v56, %v2636_v55  ;;  %v686_v56 = vld [vmem:[#allocation2 + $0x60] sm:$0xff] }
 0x472   :  { %v425_v60 = vpop.f32.mrb[5].mxu1  ;;  %v445_v61 = vsel %vm136_vm3, %v439_v57, -inf  ;;  %v437_v63 = vmul.f32 0.25, %v2149_v58 }
 0x473   :  { %v436_v0 = vmul.f32 0.25, %v425_v60  ;;  %446 = vmax.xlane.f32.xlu1 %v445_v61  ;;  %v442_v1 = vsel %vm136_vm3, %v438_v59, -inf }
 0x474   :  { %443 = vmax.xlane.f32.xlu0 %v442_v1  ;;  %v441_v5 = vadd.f32 %v437_v63, %v2650_v2  ;;  %v1964_v63 = vld [vmem:[%s2813_s3 + $0x3] ss:$0 sm:$0xff] }
 0x475   :  { %v440_v3 = vadd.f32 %v436_v0, %v2644_v62 }
 0x476   :  { %v451_v6 = vsel %vm136_vm3, %v441_v5, -inf }
 0x477   :  { %v448_v4 = vsel %vm136_vm3, %v440_v3, -inf }
 0x478   :  { %449 = vmax.xlane.f32.xlu0 %v448_v4 }
 0x47c   :  { %452 = vmax.xlane.f32.xlu0 %v451_v6 }
 0x500   :  { %v447_v7 = vpop.xlane.xlu1 %446 }
 0x501   :  { %v455_v8 = vsub.f32 %v439_v57, %v447_v7  ;;  %v444_v9 = vpop.xlane.xlu0 %443  ;;  %v2326_v57 = vpack.c.bf16 %v686_v56, %v685_v54 }
 0x502   :  { %v454_v10 = vsub.f32 %v438_v59, %v444_v9 }
 0x503   :  { %v460_v11 = vmul.f32 1.442695, %v455_v8 }
 0x504   :  { %v458_v12 = vmul.f32 1.442695, %v454_v10 }
 0x505   :  { %2460 = vpow2.f32 %v460_v11  ;;  %v450_v13 = vpop.xlane.xlu0 %449 }
 0x506   :  { %2462 = vpow2.f32 %v458_v12  ;;  %v456_v14 = vsub.f32 %v440_v3, %v450_v13 }
 0x508   :  { %v462_v15 = vmul.f32 1.442695, %v456_v14 }
 0x509   :  { %v453_v16 = vpop.xlane.xlu0 %452 }
 0x50a   :  { %2464 = vpow2.f32 %v462_v15  ;;  %v457_v17 = vsub.f32 %v441_v5, %v453_v16 }
 0x50c   :  { %v464_v18 = vmul.f32 1.442695, %v457_v17 }
 0x50e   :  { %2466 = vpow2.f32 %v464_v18  ;;  %v814_v18 = vld [vmem:[#allocation2 + $0x70] sm:$0xff] }
 0x50f   :  { %v2461_v19 = vpop.eup %2460 }
 0x510   :  { %v2463_v20 = vpop.eup %2462  ;;  %v469_v21 = vsel %vm136_vm3, %v2461_v19, 0.0 }
 0x511   :  { %470 = vadd.xlane.f32.xlu0 %v469_v21  ;;  %v466_v22 = vsel %vm136_vm3, %v2463_v20, 0.0  ;;  %v816_v21 = vld [vmem:[#allocation2 + $0x80] sm:$0xff] }
 0x512   :  { %467 = vadd.xlane.f32.xlu1 %v466_v22 }
 0x514   :  { %v2465_v23 = vpop.eup %2464 }
 0x515   :  { %v472_v24 = vsel %vm136_vm3, %v2465_v23, 0.0 }
 0x516   :  { %473 = vadd.xlane.f32.xlu1 %v472_v24  ;;  %v906_v24 = vld [vmem:[#allocation2 + $0x90] sm:$0xff] }
 0x518   :  { %v2467_v25 = vpop.eup %2466 }
 0x519   :  { %v475_v26 = vsel %vm136_vm3, %v2467_v25, 0.0 }
 0x51a   :  { %476 = vadd.xlane.f32.xlu0 %v475_v26 }
 0x527   :  { %2431 = vrot.lane.b32.xlu1 %v2602_v38, %s2537_s1  ;;  %v597_v38 = vld [vmem:[#allocation2 + $0x50] sm:$0xff] }
 0x530   :  { %2436 = vrot.lane.b32.xlu0 %v2613_v46, %s2537_s1  ;;  %v2322_v46 = vpack.c.bf16 %v597_v38, %v596_v41 }
 0x59e   :  { %v471_v28 = vpop.xlane.xlu0 %470 }
 0x59f   :  { %v468_v27 = vpop.xlane.xlu1 %467 }
 0x5a0   :  { %2468 = vrcp.f32 %v468_v27 }
 0x5a1   :  { %2470 = vrcp.f32 %v471_v28 }
 0x5a3   :  { %v474_v29 = vpop.xlane.xlu1 %473 }
 0x5a4   :  { %2472 = vrcp.f32 %v474_v29 }
 0x5a7   :  { %v2432_v30 = vpop.permute.xlu1 %2431  ;;  %v477_v33 = vpop.xlane.xlu0 %476 }
 0x5a8   :  { %v2434_v34 = vunpack.i.h.bf16 %v2432_v30  ;;  %v2433_v35 = vunpack.i.l.bf16 %v2432_v30  ;;  %2474 = vrcp.f32 %v477_v33 }
 0x5aa   :  { %v2469_v36 = vpop.eup %2468  ;;  %v2314_v37 = vpack.c.bf16 %v2434_v34, %v2433_v35  ;;  %v1967_v35 = vld [vmem:[%s2813_s3 + $0x4] ss:$0 sm:$0xff] }
 0x5ab   :  { %v2437_v39 = vpop.permute.xlu0 %2436  ;;  %v482_v40 = vmul.f32 %v2469_v36, %v2463_v20  ;;  %v2471_v47 = vpop.eup %2470  ;;  %v815_v20 = vld [vmem:[#allocation2 + $0x78] sm:$0xff] }
 0x5ac   :  { %v2439_v42 = vunpack.i.h.bf16 %v2437_v39  ;;  %v2438_v43 = vunpack.i.l.bf16 %v2437_v39  ;;  %2315 = vmatprep.subr.bf16.mxu0 %v2314_v37  ;;  %v483_v49 = vmul.f32 %v2471_v47, %v2461_v19  ;;  %v2334_v22 = vpack.c.bf16 %v816_v21, %v815_v20 }
 0x5ad   :  { %2317 = vmatpush3.bf16.msra.mxu0 %v2314_v37  ;;  %2158 = vmatprep.mubr.msk.f32.mxu0 %vm136_vm3, %v482_v40  ;;  %v1968_v40 = vld [vmem:[%s2813_s3 + $0x5] ss:$0 sm:$0xff] }
 0x5ae   :  { %v2318_v45 = vpack.c.bf16 %v2439_v42, %v2438_v43  ;;  %v2473_v48 = vpop.eup %2472 }
 0x5af   :  { %v484_v51 = vmul.f32 %v2473_v48, %v2465_v23  ;;  %v905_v23 = vld [vmem:[#allocation2 + $0x88] sm:$0xff]  ;;  %v1969_v48 = vld [vmem:[%s2813_s3 + $0x6] ss:$0 sm:$0xff] }
 0x5b0   :  { %2319 = vmatprep.subr.bf16.mxu0 %v2318_v45 }
 0x5b1   :  { %2321 = vmatpush3.bf16.msra.mxu0 %v2318_v45  ;;  %v907_v45 = vld [vmem:[#allocation2 + $0x98] sm:$0xff] }
 0x5b2   :  { %2323 = vmatprep.subr.bf16.mxu0 %v2322_v46  ;;  %v2475_v50 = vpop.eup %2474 }
 0x5b3   :  { %v485_v53 = vmul.f32 %v2475_v50, %v2467_v25  ;;  %v2338_v25 = vpack.c.bf16 %v906_v24, %v905_v23 }
 0x5b4   :  { %2159 = vmatmul.mubr.msk.f32.vlgmr.msra.gmra.mrb[4].mxu0 %vm136_vm3, %v483_v49 }
 0x5b5   :  { %2161 = vmatprep.mubr.msk.f32.mxu0 %vm136_vm3, %v484_v51  ;;  %2325 = vmatpush3.bf16.msra.mxu0 %v2322_v46  ;;  %v908_v46 = vld [vmem:[#allocation2 + $0xa0] sm:$0xff] }
 0x5b6   :  { %2327 = vmatprep.subr.bf16.mxu0 %v2326_v57  ;;  %v2342_v47 = vpack.c.bf16 %v908_v46, %v907_v45 }
 0x5b8   :  { %2162 = vmatmul.mubr.msk.f32.gmra.mrb[6].mxu0 %vm136_vm3, %v485_v53 }
 0x687   :  { %v2160_v58 = vpop.f32.mrb[4].mxu0 }
 0x688   :  { %v576_v59 = vpop.f32.mrb[5].mxu0 }
 0x689   :  { %2168 = vmatprep.mubr.msk.f32.mxu0 %vm332_vm6, %v576_v59 }
 0x68a   :  { %2169 = vmatmul.mubr.msk.f32.vlgmr.msra.gmra.mrb[8].mxu0 %vm332_vm6, %v2160_v58 }
 0x68b   :  { %2329 = vmatpush3.bf16.msra.mxu0 %v2326_v57  ;;  %v2163_v60 = vpop.f32.mrb[6].mxu0  ;;  %v1972_v57 = vld [vmem:[%s2813_s3 + $0x7] ss:$0 sm:$0xff] }
 0x68c   :  { %v586_v61 = vpop.f32.mrb[7].mxu0  ;;  %2339 = vmatprep.subr.bf16.mxu0 %v2338_v25 }
 0x68d   :  { %2175 = vmatprep.mubr.msk.f32.mxu0 %vm332_vm6, %v586_v61 }
 0x692   :  { %2176 = vmatmul.mubr.msk.f32.vlgmr.msra.gmra.mrb[8].mxu0 %vm332_vm6, %v2163_v60 }
 0x693   :  { %2341 = vmatpush3.bf16.msra.mxu0 %v2338_v25  ;;  %v1975_v25 = vld [vmem:[%s2813_s3 + $0x8] ss:$0 sm:$0xff] }
 0x694   :  { %2343 = vmatprep.subr.bf16.mxu0 %v2342_v47 }
 0x697   :  { %2345 = vmatpush3.bf16.msra.mxu0 %v2342_v47 }
 0x765   :  { %v2177_v0 = vpop.f32.mrb[8].mxu0 }
 0x766   :  { %v2406_v1 = vadd.f32 %v2177_v0, %v1964_v63  ;;  %v759_v3 = vpop.f32.mrb[9].mxu0 }
 0x767   :  { %v2407_v4 = vadd.f32 %v1964_v63, %v759_v3 }
 0x768   :  { %v771_v5 = vadd.f32 %v2406_v1, %v2591_v32 }
 0x769   :  { %v770_v6 = vadd.f32 %v2407_v4, %v2589_v31  ;;  %v813_v31 = vld [vmem:[#allocation2 + $0x68] sm:$0xff] }
 0x76a   :  { %v777_v7 = vsel %vm136_vm3, %v771_v5, 0.0  ;;  %v2330_v19 = vpack.c.bf16 %v814_v18, %v813_v31 }
 0x76b   :  { %778 = vadd.xlane.f32.xlu0 %v777_v7  ;;  %v774_v8 = vsel %vm136_vm3, %v770_v6, 0.0 }
 0x76c   :  { %775 = vadd.xlane.f32.xlu1 %v774_v8  ;;  %2331 = vmatprep.subr.bf16.mxu1 %v2330_v19 }
 0x76d   :  { %2333 = vmatpush3.bf16.msra.mxu1 %v2330_v19 }
 0x76e   :  { %2335 = vmatprep.subr.bf16.mxu1 %v2334_v22 }
 0x771   :  { %2337 = vmatpush3.bf16.msra.mxu1 %v2334_v22 }
 0x7f8   :  { %v779_v9 = vpop.xlane.xlu0 %778 }
 0x7f9   :  { %v782_v10 = vmul.f32 0.03125, %v779_v9  ;;  %v776_v11 = vpop.xlane.xlu1 %775 }
 0x7fa   :  { %v781_v12 = vmul.f32 0.03125, %v776_v11 }
 0x7fb   :  { %v784_v13 = vsub.f32 %v771_v5, %v782_v10 }
 0x7fc   :  { %v783_v14 = vsub.f32 %v770_v6, %v781_v12 }
 0x7fd   :  { %v786_v15 = vmul.f32 %v784_v13, %v784_v13 }
 0x7fe   :  { %v785_v16 = vmul.f32 %v783_v14, %v783_v14 }
 0x7ff   :  { %v790_v17 = vsel %vm136_vm3, %v786_v15, 0.0  ;;  %v1038_v15 = vld [vmem:[#allocation2 + $0xb0] sm:$0xff] }
 0x800   :  { %791 = vadd.xlane.f32.xlu0 %v790_v17  ;;  %v787_v32 = vsel %vm136_vm3, %v785_v16, 0.0  ;;  %v1039_v17 = vld [vmem:[#allocation2 + $0xb8] sm:$0xff] }
 0x801   :  { %788 = vadd.xlane.f32.xlu1 %v787_v32  ;;  %v1040_v32 = vld [vmem:[#allocation2 + $0xc0] sm:$0xff] }
 0x802   :  { %v2350_v31 = vpack.c.bf16 %v1040_v32, %v1039_v17 }
 0x88d   :  { %v792_v26 = vpop.xlane.xlu0 %791 }
 0x88e   :  { %v794_v27 = vmul.f32 0.03125, %v792_v26  ;;  %v789_v28 = vpop.xlane.xlu1 %788 }
 0x88f   :  { %v793_v29 = vmul.f32 0.03125, %v789_v28 }
 0x890   :  { %v796_v30 = vadd.f32 1e-05, %v794_v27 }
 0x891   :  { %v795_v33 = vadd.f32 1e-05, %v793_v29  ;;  %v1976_v29 = vld [vmem:[%s2813_s3 + $0x9] ss:$0 sm:$0xff] }
 0x892   :  { %2476 = vrsqrt.f32 %v796_v30 }
 0x893   :  { %2478 = vrsqrt.f32 %v795_v33 }
 0x89c   :  { %v2477_v34 = vpop.eup %2476 }
 0x89d   :  { %v2479_v36 = vpop.eup %2478  ;;  %v800_v37 = vmul.f32 %v2477_v34, %v784_v13 }
 0x89e   :  { %v799_v39 = vmul.f32 %v2479_v36, %v783_v14  ;;  %v1037_v14 = vld [vmem:[#allocation2 + $0xa8] sm:$0xff] }
 0x89f   :  { %v806_v41 = vmul.f32 %v1967_v35, %v800_v37  ;;  %v2346_v16 = vpack.c.bf16 %v1038_v15, %v1037_v14  ;;  %v1977_v36 = vld [vmem:[%s2813_s3 + $0xa] ss:$0 sm:$0xff] }
 0x8a0   :  { %v805_v38 = vmul.f32 %v1967_v35, %v799_v39 }
 0x8a1   :  { %v812_v43 = vadd.f32 %v1968_v40, %v806_v41  ;;  %2347 = vmatprep.subr.bf16.mxu1 %v2346_v16 }
 0x8a2   :  { %v811_v42 = vadd.f32 %v1968_v40, %v805_v38 }
 0x8a4   :  { %2186 = vmatprep.mubr.msk.f32.mxu1 %vm136_vm3, %v811_v42 }
 0x8a5   :  { %2187 = vmatmul.mubr.msk.f32.vlgmr.msra.gmra.mrb[6].mxu1 %vm136_vm3, %v812_v43 }
 0x8a6   :  { %2349 = vmatpush3.bf16.msra.mxu1 %v2346_v16 }
 0x8a7   :  { %2351 = vmatprep.subr.bf16.mxu1 %v2350_v31 }
 0x8aa   :  { %2353 = vmatpush3.bf16.msra.mxu1 %v2350_v31 }
 0x978   :  { %v2188_v49 = vpop.f32.mrb[6].mxu1 }
 0x979   :  { %v900_v50 = vadd.f32 %v2188_v49, %v1969_v48  ;;  %v894_v51 = vpop.f32.mrb[7].mxu1 }
 0x97a   :  { %v895_v53 = vadd.f32 %v1969_v48, %v894_v51 }
 0x97b   :  { %v904_v56 = vmax.f32 %v900_v50, 0.0 }
 0x97c   :  { %v903_v54 = vmax.f32 %v895_v53, 0.0 }
 0x97e   :  { %2197 = vmatprep.mubr.msk.f32.mxu0 %vm136_vm3, %v903_v54 }
 0x97f   :  { %2198 = vmatmul.mubr.msk.f32.vlgmr.msra.gmra.mrb[10].mxu0 %vm136_vm3, %v904_v56 }
 0xa52   :  { %v2199_v58 = vpop.f32.mrb[10].mxu0 }
 0xa53   :  { %v992_v59 = vadd.f32 %v2199_v58, %v1972_v57  ;;  %v986_v60 = vpop.f32.mrb[11].mxu0 }
 0xa54   :  { %v987_v61 = vadd.f32 %v1972_v57, %v986_v60 }
 0xa55   :  { %v996_v63 = vadd.f32 %v992_v59, %v812_v43 }
 0xa56   :  { %v995_v0 = vadd.f32 %v987_v61, %v811_v42 }
 0xa57   :  { %v1002_v1 = vsel %vm136_vm3, %v996_v63, 0.0 }
 0xa58   :  { %1003 = vadd.xlane.f32.xlu0 %v1002_v1  ;;  %v999_v3 = vsel %vm136_vm3, %v995_v0, 0.0 }
 0xa59   :  { %1000 = vadd.xlane.f32.xlu1 %v999_v3 }
 0xae5   :  { %v1004_v4 = vpop.xlane.xlu0 %1003 }
 0xae6   :  { %v1006_v5 = vmul.f32 0.03125, %v1004_v4  ;;  %v1001_v6 = vpop.xlane.xlu1 %1000 }
 0xae7   :  { %v1005_v7 = vmul.f32 0.03125, %v1001_v6 }
 0xae8   :  { %v1008_v8 = vsub.f32 %v996_v63, %v1006_v5 }
 0xae9   :  { %v1007_v9 = vsub.f32 %v995_v0, %v1005_v7 }
 0xaea   :  { %v1010_v10 = vmul.f32 %v1008_v8, %v1008_v8 }
 0xaeb   :  { %v1009_v11 = vmul.f32 %v1007_v9, %v1007_v9 }
 0xaec   :  { %v1014_v12 = vsel %vm136_vm3, %v1010_v10, 0.0 }
 0xaed   :  { %1015 = vadd.xlane.f32.xlu0 %v1014_v12  ;;  %v1011_v13 = vsel %vm136_vm3, %v1009_v11, 0.0 }
 0xaee   :  { %1012 = vadd.xlane.f32.xlu1 %v1011_v13 }
 0xb7a   :  { %v1016_v18 = vpop.xlane.xlu0 %1015 }
 0xb7b   :  { %v1018_v19 = vmul.f32 0.03125, %v1016_v18  ;;  %v1013_v20 = vpop.xlane.xlu1 %1012 }
 0xb7c   :  { %v1017_v21 = vmul.f32 0.03125, %v1013_v20 }
 0xb7d   :  { %v1020_v22 = vadd.f32 1e-05, %v1018_v19 }
 0xb7e   :  { %v1019_v23 = vadd.f32 1e-05, %v1017_v21 }
 0xb7f   :  { %2480 = vrsqrt.f32 %v1020_v22 }
 0xb80   :  { %2482 = vrsqrt.f32 %v1019_v23 }
 0xb89   :  { %v2481_v24 = vpop.eup %2480 }
 0xb8a   :  { %v2483_v26 = vpop.eup %2482  ;;  %v1024_v27 = vmul.f32 %v2481_v24, %v1008_v8 }
 0xb8b   :  { %v1023_v28 = vmul.f32 %v2483_v26, %v1007_v9 }
 0xb8c   :  { %v1030_v30 = vmul.f32 %v1975_v25, %v1024_v27 }
 0xb8d   :  { %v1029_v33 = vmul.f32 %v1975_v25, %v1023_v28 }
 0xb8e   :  { %v2709_v35 = vadd.f32 %v1976_v29, %v1030_v30 }
 0xb8f   :  { %v2707_v34 = vadd.f32 %v1976_v29, %v1029_v33 }
 0xb91   :  { %2208 = vmatprep.mubr.msk.f32.mxu1 %vm136_vm3, %v2707_v34 }
 0xb92   :  { %2209 = vmatmul.mubr.msk.f32.vlgmr.msra.gmra.mrb[8].mxu1 %vm136_vm3, %v2709_v35 }
 0xc65   :  { %v2210_v37 = vpop.f32.mrb[8].mxu1 }
 0xc66   :  { %v1124_v39 = vadd.f32 %v2210_v37, %v1977_v36  ;;  %v1118_v40 = vpop.f32.mrb[9].mxu1 }
 0xc67   :  { %v1119_v41 = vadd.f32 %v1977_v36, %v1118_v40  ;;  %v1405_v40 = vld [vmem:[#allocation2 + $0xd0] sm:$0xff] }
 0xc68   :  { %1131 = vrot.lane.b32.xlu0 %v1124_v39, %s2535_s11 }
 0xc69   :  { %1129 = vrot.lane.b32.xlu1 %v1119_v41, %s2535_s11  ;;  %2219 = vmatprep.mubr.msk.f32.mxu0 %vm332_vm6, %v1119_v41  ;;  %v2721_v38 = vpack.i.bf16 %v1124_v39, %v1119_v41 }
 0xc6d   :  { %2441 = vrot.lane.b32.xlu1 %v2721_v38, %s2536_s12 }
 0xcda   :  { %v1132_v42 = vpop.permute.xlu0 %1131 }
 0xcdb   :  { %v1130_v43 = vpop.permute.xlu1 %1129 }
 0xcdc   :  { %v2725_v45 = vpack.i.bf16 %v1132_v42, %v1130_v43 }
 0xcde   :  { %2446 = vrot.lane.b32.xlu1 %v2725_v45, %s2536_s12 }
 0xcdf   :  { %v2442_v46 = vpop.permute.xlu1 %2441 }
 0xce0   :  { %v2444_v47 = vunpack.i.h.bf16 %v2442_v46  ;;  %v2443_v48 = vunpack.i.l.bf16 %v2442_v46 }
 0xce2   :  { %v2354_v49 = vpack.c.bf16 %v2444_v47, %v2443_v48 }
 0xce4   :  { %2356 = vmatprep.subr.msk.bf16.mxu0 %vm2609_vm7, %v2354_v49 }
 0xce5   :  { %2359 = vmatpush3.bf16.xpose.msk.msra.mxu0 %vm2609_vm7, %v2354_v49 }
 0xd50   :  { %v2447_v50 = vpop.permute.xlu1 %2446 }
 0xd51   :  { %v2449_v51 = vunpack.i.h.bf16 %v2447_v50  ;;  %v2448_v53 = vunpack.i.l.bf16 %v2447_v50 }
 0xd53   :  { %v2360_v54 = vpack.c.bf16 %v2449_v51, %v2448_v53  ;;  %v1493_v51 = vld [vmem:[#allocation2 + $0xd8] sm:$0xff]  ;;  %v1494_v53 = vld [vmem:[#allocation2 + $0xe0] sm:$0xff] }
 0xd55   :  { %2362 = vmatprep.subr.msk.bf16.mxu0 %vm2609_vm7, %v2360_v54 }
 0xd56   :  { %2365 = vmatpush3.bf16.xpose.msk.msra.mxu0 %vm2609_vm7, %v2360_v54  ;;  %v2378_v54 = vpack.c.bf16 %v1494_v53, %v1493_v51 }
 0xd5d   :  { %2220 = vmatmul.mubr.msk.f32.vlgmr.msra.gmra.mrb[12].mxu0 %vm332_vm6, %v1124_v39  ;;  %v1404_v39 = vld [vmem:[#allocation2 + $0xc8] sm:$0xff] }
 0xd5e   :  { %2222 = vmatprep.mubr.msk.f32.mxu0 %vm332_vm6, %v1130_v43  ;;  %v2374_v43 = vpack.c.bf16 %v1405_v40, %v1404_v39  ;;  %v1715_v39 = vld [vmem:[#allocation2 + $0x120] sm:$0xff] }
 0xd61   :  { %2223 = vmatmul.mubr.msk.f32.gmra.mrb[14].mxu0 %vm332_vm6, %v1132_v42 }
 0xe30   :  { %v2221_v56 = vpop.f32.mrb[12].mxu0 }
 0xe31   :  { %v1243_v57 = vmul.f32 0.25, %v2221_v56  ;;  %v1223_v58 = vpop.f32.mrb[13].mxu0 }
 0xe32   :  { %v1242_v59 = vmul.f32 0.25, %v1223_v58 }
 0xe33   :  { %v1247_v60 = vadd.f32 %v1243_v57, %v2631_v52 }
 0xe34   :  { %v2224_v61 = vpop.f32.mrb[14].mxu0  ;;  %v1246_v63 = vadd.f32 %v1242_v59, %v2636_v55 }
 0xe35   :  { %v1233_v0 = vpop.f32.mrb[15].mxu0  ;;  %v1253_v1 = vsel %vm136_vm3, %v1247_v60, -inf  ;;  %v1245_v44 = vmul.f32 0.25, %v2224_v61 }
 0xe36   :  { %v1244_v3 = vmul.f32 0.25, %v1233_v0  ;;  %1254 = vmax.xlane.f32.xlu1 %v1253_v1  ;;  %v1250_v4 = vsel %vm136_vm3, %v1246_v63, -inf }
 0xe37   :  { %1251 = vmax.xlane.f32.xlu0 %v1250_v4  ;;  %v1249_v7 = vadd.f32 %v1245_v44, %v2650_v2 }
 0xe38   :  { %v1248_v5 = vadd.f32 %v1244_v3, %v2644_v62 }
 0xe39   :  { %v1259_v52 = vsel %vm136_vm3, %v1249_v7, -inf }
 0xe3a   :  { %v1256_v6 = vsel %vm136_vm3, %v1248_v5, -inf }
 0xe3b   :  { %1257 = vmax.xlane.f32.xlu0 %v1256_v6 }
 0xe3f   :  { %1260 = vmax.xlane.f32.xlu0 %v1259_v52 }
 0xec3   :  { %v1255_v55 = vpop.xlane.xlu1 %1254 }
 0xec4   :  { %v1263_v8 = vsub.f32 %v1247_v60, %v1255_v55  ;;  %v1252_v9 = vpop.xlane.xlu0 %1251  ;;  %v1994_v60 = vld [vmem:[%s2813_s3 + $0xb] ss:$0 sm:$0xff] }
 0xec5   :  { %v1262_v10 = vsub.f32 %v1246_v63, %v1252_v9 }
 0xec6   :  { %v1268_v11 = vmul.f32 1.442695, %v1263_v8 }
 0xec7   :  { %v1266_v12 = vmul.f32 1.442695, %v1262_v10 }
 0xec8   :  { %2484 = vpow2.f32 %v1268_v11  ;;  %v1258_v13 = vpop.xlane.xlu0 %1257 }
 0xec9   :  { %2486 = vpow2.f32 %v1266_v12  ;;  %v1264_v14 = vsub.f32 %v1248_v5, %v1258_v13  ;;  %v1621_v13 = vld [vmem:[#allocation2 + $0xf0] sm:$0xff] }
 0xecb   :  { %v1270_v15 = vmul.f32 1.442695, %v1264_v14 }
 0xecc   :  { %v1261_v62 = vpop.xlane.xlu0 %1260 }
 0xecd   :  { %2488 = vpow2.f32 %v1270_v15  ;;  %v1265_v16 = vsub.f32 %v1249_v7, %v1261_v62  ;;  %v1622_v15 = vld [vmem:[#allocation2 + $0xf8] sm:$0xff]  ;;  %v1623_v62 = vld [vmem:[#allocation2 + $0x100] sm:$0xff] }
 0xecf   :  { %v1272_v17 = vmul.f32 1.442695, %v1265_v16  ;;  %v2386_v16 = vpack.c.bf16 %v1623_v62, %v1622_v15  ;;  %v2005_v15 = vld [vmem:[%s2813_s3 + $0x10] ss:$0 sm:$0xff] }
 0xed1   :  { %2490 = vpow2.f32 %v1272_v17  ;;  %v1712_v17 = vld [vmem:[#allocation2 + $0x108] sm:$0xff] }
 0xed2   :  { %v2485_v2 = vpop.eup %2484 }
 0xed3   :  { %v2487_v32 = vpop.eup %2486  ;;  %v1277_v31 = vsel %vm136_vm3, %v2485_v2, 0.0 }
 0xed4   :  { %1278 = vadd.xlane.f32.xlu0 %v1277_v31  ;;  %v1274_v18 = vsel %vm136_vm3, %v2487_v32, 0.0 }
 0xed5   :  { %1275 = vadd.xlane.f32.xlu1 %v1274_v18 }
 0xed7   :  { %v2489_v19 = vpop.eup %2488 }
 0xed8   :  { %v1280_v20 = vsel %vm136_vm3, %v2489_v19, 0.0 }
 0xed9   :  { %1281 = vadd.xlane.f32.xlu1 %v1280_v20 }
 0xedb   :  { %v2491_v21 = vpop.eup %2490 }
 0xedc   :  { %v1283_v22 = vsel %vm136_vm3, %v2491_v21, 0.0 }
 0xedd   :  { %1284 = vadd.xlane.f32.xlu0 %v1283_v22 }
 0xeea   :  { %2451 = vrot.lane.b32.xlu1 %v2721_v38, %s2537_s1 }
 0xef3   :  { %2456 = vrot.lane.b32.xlu0 %v2725_v45, %s2537_s1 }
 0xf61   :  { %v1279_v24 = vpop.xlane.xlu0 %1278 }
 0xf62   :  { %v1276_v23 = vpop.xlane.xlu1 %1275 }
 0xf63   :  { %2492 = vrcp.f32 %v1276_v23 }
 0xf64   :  { %2494 = vrcp.f32 %v1279_v24  ;;  %v1997_v24 = vld [vmem:[%s2813_s3 + $0xc] ss:$0 sm:$0xff] }
 0xf66   :  { %v1282_v25 = vpop.xlane.xlu1 %1281 }
 0xf67   :  { %2496 = vrcp.f32 %v1282_v25 }
 0xf6a   :  { %v2452_v26 = vpop.permute.xlu1 %2451  ;;  %v1285_v27 = vpop.xlane.xlu0 %1284 }
 0xf6b   :  { %v2454_v28 = vunpack.i.h.bf16 %v2452_v26  ;;  %v2453_v29 = vunpack.i.l.bf16 %v2452_v26  ;;  %2498 = vrcp.f32 %v1285_v27 }
 0xf6d   :  { %v2493_v30 = vpop.eup %2492  ;;  %v2366_v33 = vpack.c.bf16 %v2454_v28, %v2453_v29  ;;  %v1998_v28 = vld [vmem:[%s2813_s3 + $0xd] ss:$0 sm:$0xff] }
 0xf6e   :  { %v2457_v36 = vpop.permute.xlu0 %2456  ;;  %v1290_v37 = vmul.f32 %v2493_v30, %v2487_v32  ;;  %v2495_v45 = vpop.eup %2494 }
 0xf6f   :  { %v2459_v41 = vunpack.i.h.bf16 %v2457_v36  ;;  %v2458_v38 = vunpack.i.l.bf16 %v2457_v36  ;;  %2367 = vmatprep.subr.bf16.mxu1 %v2366_v33  ;;  %v1291_v47 = vmul.f32 %v2495_v45, %v2485_v2  ;;  %v1713_v2 = vld [vmem:[#allocation2 + $0x110] sm:$0xff] }
 0xf70   :  { %2369 = vmatpush3.bf16.msra.mxu1 %v2366_v33  ;;  %2233 = vmatprep.mubr.msk.f32.mxu1 %vm136_vm3, %v1290_v37  ;;  %v2390_v32 = vpack.c.bf16 %v1713_v2, %v1712_v17  ;;  %v1714_v37 = vld [vmem:[#allocation2 + $0x118] sm:$0xff]  ;;  %v2006_v2 = vld [vmem:[%s2813_s3 + $0x11] ss:$0 sm:$0xff] }
 0xf71   :  { %v2370_v42 = vpack.c.bf16 %v2459_v41, %v2458_v38  ;;  %v2497_v46 = vpop.eup %2496  ;;  %v2394_v40 = vpack.c.bf16 %v1715_v39, %v1714_v37  ;;  %v1999_v41 = vld [vmem:[%s2813_s3 + $0xe] ss:$0 sm:$0xff] }
 0xf72   :  { %v1292_v49 = vmul.f32 %v2497_v46, %v2489_v19 }
 0xf73   :  { %2371 = vmatprep.subr.bf16.mxu1 %v2370_v42 }
 0xf74   :  { %2373 = vmatpush3.bf16.msra.mxu1 %v2370_v42 }
 0xf75   :  { %2375 = vmatprep.subr.bf16.mxu1 %v2374_v43  ;;  %v2499_v48 = vpop.eup %2498 }
 0xf76   :  { %v1293_v50 = vmul.f32 %v2499_v48, %v2491_v21  ;;  %v2002_v48 = vld [vmem:[%s2813_s3 + $0xf] ss:$0 sm:$0xff] }
 0xf77   :  { %2234 = vmatmul.mubr.msk.f32.vlgmr.msra.gmra.mrb[10].mxu1 %vm136_vm3, %v1291_v47 }
 0xf78   :  { %2236 = vmatprep.mubr.msk.f32.mxu1 %vm136_vm3, %v1292_v49  ;;  %2377 = vmatpush3.bf16.msra.mxu1 %v2374_v43 }
 0xf79   :  { %2379 = vmatprep.subr.bf16.mxu1 %v2378_v54 }
 0xf7b   :  { %2237 = vmatmul.mubr.msk.f32.gmra.mrb[12].mxu1 %vm136_vm3, %v1293_v50 }
0x104a   :  { %v2235_v56 = vpop.f32.mrb[10].mxu1 }
0x104b   :  { %v1384_v57 = vpop.f32.mrb[11].mxu1 }
0x104c   :  { %2243 = vmatprep.mubr.msk.f32.mxu1 %vm332_vm6, %v1384_v57 }
0x104d   :  { %2244 = vmatmul.mubr.msk.f32.vlgmr.msra.gmra.mrb[14].mxu1 %vm332_vm6, %v2235_v56 }
0x104e   :  { %2381 = vmatpush3.bf16.msra.mxu1 %v2378_v54  ;;  %v2238_v58 = vpop.f32.mrb[12].mxu1 }
0x104f   :  { %v1394_v59 = vpop.f32.mrb[13].mxu1  ;;  %2391 = vmatprep.subr.bf16.mxu1 %v2390_v32 }
0x1050   :  { %2250 = vmatprep.mubr.msk.f32.mxu1 %vm332_vm6, %v1394_v59 }
0x1055   :  { %2251 = vmatmul.mubr.msk.f32.vlgmr.msra.gmra.mrb[14].mxu1 %vm332_vm6, %v2238_v58 }
0x1056   :  { %2393 = vmatpush3.bf16.msra.mxu1 %v2390_v32 }
0x1057   :  { %2395 = vmatprep.subr.bf16.mxu1 %v2394_v40 }
0x105a   :  { %2397 = vmatpush3.bf16.msra.mxu1 %v2394_v40 }
0x1128   :  { %v2252_v61 = vpop.f32.mrb[14].mxu1 }
0x1129   :  { %v2408_v63 = vadd.f32 %v2252_v61, %v1994_v60  ;;  %v1567_v0 = vpop.f32.mrb[15].mxu1 }
0x112a   :  { %v2409_v1 = vadd.f32 %v1994_v60, %v1567_v0 }
0x112b   :  { %v1579_v44 = vadd.f32 %v2408_v63, %v2709_v35 }
0x112c   :  { %v1578_v3 = vadd.f32 %v2409_v1, %v2707_v34  ;;  %v1620_v34 = vld [vmem:[#allocation2 + $0xe8] sm:$0xff] }
0x112d   :  { %v1585_v4 = vsel %vm136_vm3, %v1579_v44, 0.0  ;;  %v2382_v14 = vpack.c.bf16 %v1621_v13, %v1620_v34 }
0x112e   :  { %1586 = vadd.xlane.f32.xlu0 %v1585_v4  ;;  %v1582_v5 = vsel %vm136_vm3, %v1578_v3, 0.0 }
0x112f   :  { %1583 = vadd.xlane.f32.xlu1 %v1582_v5  ;;  %2383 = vmatprep.subr.bf16.mxu0 %v2382_v14 }
0x1130   :  { %2385 = vmatpush3.bf16.msra.mxu0 %v2382_v14 }
0x1131   :  { %2387 = vmatprep.subr.bf16.mxu0 %v2386_v16 }
0x1134   :  { %2389 = vmatpush3.bf16.msra.mxu0 %v2386_v16 }
0x11bb   :  { %v1587_v6 = vpop.xlane.xlu0 %1586 }
0x11bc   :  { %v1589_v7 = vmul.f32 0.03125, %v1587_v6  ;;  %v1584_v52 = vpop.xlane.xlu1 %1583  ;;  %v1844_v6 = vld [vmem:[#allocation2 + $0x128] sm:$0xff] }
0x11bd   :  { %v1588_v55 = vmul.f32 0.03125, %v1584_v52 }
0x11be   :  { %v1591_v8 = vsub.f32 %v1579_v44, %v1589_v7  ;;  %v1845_v7 = vld [vmem:[#allocation2 + $0x130] sm:$0xff] }
0x11bf   :  { %v1590_v9 = vsub.f32 %v1578_v3, %v1588_v55  ;;  %v2398_v52 = vpack.c.bf16 %v1845_v7, %v1844_v6  ;;  %v1846_v55 = vld [vmem:[#allocation2 + $0x138] sm:$0xff] }
0x11c0   :  { %v1593_v10 = vmul.f32 %v1591_v8, %v1591_v8 }
0x11c1   :  { %v1592_v11 = vmul.f32 %v1590_v9, %v1590_v9  ;;  %2399 = vmatprep.subr.bf16.mxu0 %v2398_v52 }
0x11c2   :  { %v1597_v12 = vsel %vm136_vm3, %v1593_v10, 0.0 }
0x11c3   :  { %1598 = vadd.xlane.f32.xlu0 %v1597_v12  ;;  %v1594_v35 = vsel %vm136_vm3, %v1592_v11, 0.0 }
0x11c4   :  { %1595 = vadd.xlane.f32.xlu1 %v1594_v35 }
0x1250   :  { %v1599_v31 = vpop.xlane.xlu0 %1598 }
0x1251   :  { %v1601_v18 = vmul.f32 0.03125, %v1599_v31  ;;  %v1596_v19 = vpop.xlane.xlu1 %1595 }
0x1252   :  { %v1600_v20 = vmul.f32 0.03125, %v1596_v19 }
0x1253   :  { %v1603_v21 = vadd.f32 1e-05, %v1601_v18 }
0x1254   :  { %v1602_v22 = vadd.f32 1e-05, %v1600_v20  ;;  %v2007_v20 = vld [vmem:[%s2813_s3 + $0x12] ss:$0 sm:$0xff] }
0x1255   :  { %2500 = vrsqrt.f32 %v1603_v21 }
0x1256   :  { %2502 = vrsqrt.f32 %v1602_v22 }
0x125f   :  { %v2501_v23 = vpop.eup %2500 }
0x1260   :  { %v2503_v25 = vpop.eup %2502  ;;  %v1607_v26 = vmul.f32 %v2501_v23, %v1591_v8  ;;  %v1847_v8 = vld [vmem:[#allocation2 + $0x140] sm:$0xff] }
0x1261   :  { %v1606_v27 = vmul.f32 %v2503_v25, %v1590_v9  ;;  %v2402_v9 = vpack.c.bf16 %v1847_v8, %v1846_v55 }
0x1262   :  { %v1613_v29 = vmul.f32 %v1997_v24, %v1607_v26 }
0x1263   :  { %v1612_v30 = vmul.f32 %v1997_v24, %v1606_v27 }
0x1264   :  { %v1619_v36 = vadd.f32 %v1998_v28, %v1613_v29 }
0x1265   :  { %v1618_v33 = vadd.f32 %v1998_v28, %v1612_v30 }
0x1267   :  { %2261 = vmatprep.mubr.msk.f32.mxu0 %vm136_vm3, %v1618_v33 }
0x1268   :  { %2262 = vmatmul.mubr.msk.f32.vlgmr.msra.gmra.mrb[16].mxu0 %vm136_vm3, %v1619_v36 }
0x1269   :  { %2401 = vmatpush3.bf16.msra.mxu0 %v2398_v52 }
0x126a   :  { %2403 = vmatprep.subr.bf16.mxu0 %v2402_v9 }
0x126d   :  { %2405 = vmatpush3.bf16.msra.mxu0 %v2402_v9 }
0x133b   :  { %v2263_v38 = vpop.f32.mrb[16].mxu0 }
0x133c   :  { %v1707_v42 = vadd.f32 %v2263_v38, %v1999_v41  ;;  %v1701_v43 = vpop.f32.mrb[17].mxu0 }
0x133d   :  { %v1702_v45 = vadd.f32 %v1999_v41, %v1701_v43 }
0x133e   :  { %v1711_v47 = vmax.f32 %v1707_v42, 0.0 }
0x133f   :  { %v1710_v46 = vmax.f32 %v1702_v45, 0.0 }
0x1341   :  { %2272 = vmatprep.mubr.msk.f32.mxu1 %vm136_vm3, %v1710_v46 }
0x1342   :  { %2273 = vmatmul.mubr.msk.f32.vlgmr.msra.gmra.mrb[16].mxu1 %vm136_vm3, %v1711_v47 }
0x1415   :  { %v2274_v49 = vpop.f32.mrb[16].mxu1 }
0x1416   :  { %v1799_v50 = vadd.f32 %v2274_v49, %v2002_v48  ;;  %v1793_v51 = vpop.f32.mrb[17].mxu1 }
0x1417   :  { %v1794_v53 = vadd.f32 %v2002_v48, %v1793_v51 }
0x1418   :  { %v1803_v54 = vadd.f32 %v1799_v50, %v1619_v36 }
0x1419   :  { %v1802_v56 = vadd.f32 %v1794_v53, %v1618_v33 }
0x141a   :  { %v1809_v57 = vsel %vm136_vm3, %v1803_v54, 0.0 }
0x141b   :  { %1810 = vadd.xlane.f32.xlu0 %v1809_v57  ;;  %v1806_v58 = vsel %vm136_vm3, %v1802_v56, 0.0 }
0x141c   :  { %1807 = vadd.xlane.f32.xlu1 %v1806_v58 }
0x14a8   :  { %v1811_v59 = vpop.xlane.xlu0 %1810 }
0x14a9   :  { %v1813_v60 = vmul.f32 0.03125, %v1811_v59  ;;  %v1808_v61 = vpop.xlane.xlu1 %1807 }
0x14aa   :  { %v1812_v63 = vmul.f32 0.03125, %v1808_v61 }
0x14ab   :  { %v1815_v0 = vsub.f32 %v1803_v54, %v1813_v60 }
0x14ac   :  { %v1814_v1 = vsub.f32 %v1802_v56, %v1812_v63 }
0x14ad   :  { %v1817_v44 = vmul.f32 %v1815_v0, %v1815_v0 }
0x14ae   :  { %v1816_v3 = vmul.f32 %v1814_v1, %v1814_v1 }
0x14af   :  { %v1821_v4 = vsel %vm136_vm3, %v1817_v44, 0.0 }
0x14b0   :  { %1822 = vadd.xlane.f32.xlu0 %v1821_v4  ;;  %v1818_v5 = vsel %vm136_vm3, %v1816_v3, 0.0 }
0x14b1   :  { %1819 = vadd.xlane.f32.xlu1 %v1818_v5 }
0x153d   :  { %v1823_v10 = vpop.xlane.xlu0 %1822 }
0x153e   :  { %v1825_v11 = vmul.f32 0.03125, %v1823_v10  ;;  %v1820_v12 = vpop.xlane.xlu1 %1819 }
0x153f   :  { %v1824_v35 = vmul.f32 0.03125, %v1820_v12 }
0x1540   :  { %v1827_v34 = vadd.f32 1e-05, %v1825_v11 }
0x1541   :  { %v1826_v13 = vadd.f32 1e-05, %v1824_v35 }
0x1542   :  { %2504 = vrsqrt.f32 %v1827_v34 }
0x1543   :  { %2506 = vrsqrt.f32 %v1826_v13 }
0x154c   :  { %v2505_v14 = vpop.eup %2504 }
0x154d   :  { %v2507_v62 = vpop.eup %2506  ;;  %v1831_v16 = vmul.f32 %v2505_v14, %v1815_v0 }
0x154e   :  { %v1830_v17 = vmul.f32 %v2507_v62, %v1814_v1 }
0x154f   :  { %v1837_v32 = vmul.f32 %v2005_v15, %v1831_v16 }
0x1550   :  { %v1836_v31 = vmul.f32 %v2005_v15, %v1830_v17 }
0x1551   :  { %v1843_v19 = vadd.f32 %v2006_v2, %v1837_v32 }
0x1552   :  { %v1842_v18 = vadd.f32 %v2006_v2, %v1836_v31 }
0x1554   :  { %2283 = vmatprep.mubr.msk.f32.mxu0 %vm136_vm3, %v1842_v18 }
0x1555   :  { %2284 = vmatmul.mubr.msk.f32.vlgmr.msra.gmra.mrb[18].mxu0 %vm136_vm3, %v1843_v19 }
0x1628   :  { %v2285_v21 = vpop.f32.mrb[18].mxu0 }
0x1629   :  { %v1931_v22 = vadd.f32 %v2285_v21, %v2007_v20  ;;  %v1925_v23 = vpop.f32.mrb[19].mxu0 }
0x162a   :  { %v1926_v24 = vadd.f32 %v2007_v20, %v1925_v23 }
0x162b   :  { %1935 = vst [vmem:[%s2814_s4 + $0x8] sm:$0xff] %v1931_v22 }
0x162c   :  { %1934 = vst [vmem:[%s2814_s4] sm:$0xff] %v1926_v24 }
0x162d   :  { %1940 = vsyncpa [#allocation3], 1 }

</bundles_post_ra>
